<compile_context>
chip_gen: v7x
topology: tpu7x:2x2x1
jax: 0.10.0
libtpu: 0.0.40
codegen_flags: <defaults>
</compile_context>

<pallas_src>
import math

import jax
import jax.numpy as jnp
import numpy as np
from jax.experimental import pallas as pl
from jax.experimental.pallas import tpu as pltpu

# ---- fixed network configuration -------------------------------------------
OBS = 8       # observation_dim
H1 = 64       # fc_out_features[0]
H2 = 64       # fc_out_features[1]
HA = 32       # actor_features[0]
HC = 32       # critic_features[0]
NA = 4        # action_space.n (discrete)

_LN_EPS = 1e-5   # nn.LayerNorm default eps
PW = 128         # packed-parameter / output lane width

# ---- packed WEIGHT buffer (dtype f32 or bf16) row layout ---------------------
R_W1 = 0                    # (OBS, H1)        rows   0:8
R_W2 = R_W1 + OBS           # (H1, H2)         rows   8:72
R_WB = R_W2 + H1            # (H2, HA+HC)      rows  72:136   [wa || wc]
R_WH = R_WB + H2            # (HA+HC, PW)      rows 136:200   block-diag [wl ; wv]
W_ROWS = R_WH + HA + HC     # 200 rows (multiple of 8)

# ---- packed STATS + VECTOR buffer (always f32) row layout --------------------
R_S64 = 0                   # (H1, H1)  all-ones / H1           rows   0:64
R_SBLK = R_S64 + H1         # (64, 64)  blockdiag ones/32       rows  64:128
R_SSUM = R_SBLK + H2        # (PW, PW)  ones on rows 0:NA       rows 128:256
R_VEC = R_SSUM + PW         # 10 vector rows                    rows 256:266
V_B1, V_G1, V_BE1 = 0, 1, 2
V_B2, V_G2, V_BE2 = 3, 4, 5
V_BB, V_GB, V_BEB = 6, 7, 8           # fused branch bias / gamma / beta
V_BH = 9                              # fused head bias (bl || bv)
S_ROWS = 272                          # 266 padded up to a multiple of 8


# ------------------------------- kernel --------------------------------------
def actor_critic_kernel(x_ref, w_ref, s_ref, out_ref):
    f32 = jnp.float32
    HI = jax.lax.Precision.HIGHEST

    def wmm(h, w):
        # Weight matmul: cast activations to the weight dtype (bf16 fast path on
        # the MXU); always accumulate in f32.
        return jnp.dot(h.astype(w.dtype), w, preferred_element_type=f32, precision=HI)

    def smm(h, s):
        # Stats matmul (reduction matrices): keep everything in f32.
        return jnp.dot(h, s, preferred_element_type=f32, precision=HI)

    def vec(row, width):
        return s_ref[R_VEC + row:R_VEC + row + 1, 0:width]

    def ln_tanh(h, stat, g_row, b_row, width):
        # Two-pass LayerNorm on the MXU (matches torch's biased variance):
        #   mu  = h @ stat          (means, already broadcast per group)
        #   var = (h-mu)^2 @ stat   (biased variances, already broadcast)
        mu = smm(h, stat)
        d = h - mu
        var = smm(d * d, stat)
        return jnp.tanh(d * jax.lax.rsqrt(var + _LN_EPS) * vec(g_row, width)
                        + vec(b_row, width))

    x = x_ref[...]

    s_ln64 = s_ref[R_S64:R_S64 + H1, 0:H1]          # all-ones / 64
    s_blk = s_ref[R_SBLK:R_SBLK + H2, 0:HA + HC]    # block-diag all-ones / 32
    s_sum = s_ref[R_SSUM:R_SSUM + PW, 0:PW]         # ones on rows 0:NA (lse sum)

    # shared trunk: (Linear -> LayerNorm -> tanh) x 2
    h = wmm(x, w_ref[R_W1:R_W1 + OBS, 0:H1]) + vec(V_B1, H1)
    h = ln_tanh(h, s_ln64, V_G1, V_BE1, H1)
    h = wmm(h, w_ref[R_W2:R_W2 + H1, 0:H2]) + vec(V_B2, H2)
    h = ln_tanh(h, s_ln64, V_G2, V_BE2, H2)

    # fused actor||critic branch: one (H2, HA+HC) matmul + block-diag per-half LN
    hb = wmm(h, w_ref[R_WB:R_WB + H2, 0:HA + HC]) + vec(V_BB, HA + HC)
    ac = ln_tanh(hb, s_blk, V_GB, V_BEB, HA + HC)   # [tanh(LN(actor)) || tanh(LN(critic))]

    # fused head: block-diagonal weight -> (TB, PW): logits in cols 0:NA, value in col NA
    head = wmm(ac, w_ref[R_WH:R_WH + HA + HC, :]) + vec(V_BH, PW)

    # log-softmax over the NA logit columns:
    #   max stays on the XLU; sum(exp) + its lane-broadcast go through the MXU.
    hcol = jax.lax.broadcasted_iota(jnp.int32, head.shape, 1)
    is_logit = hcol < NA
    masked = jnp.where(is_logit, head, -jnp.inf)
    m = jnp.max(masked, axis=-1, keepdims=True)
    sum_exp = smm(jnp.exp(masked - m), s_sum)       # every lane = sum over logit cols
    # lane-dense output slab: normalized log-probs | value | zeros
    out_ref[...] = jnp.where(is_logit, head - (m + jnp.log(sum_exp)), head)


# ------------------------------- wrapper --------------------------------------
def _round_up(a, m):
    return ((a + m - 1) // m) * m


def actor_critic_forward(x, wbuf, sbuf, tile_b=1024):
    """Returns (log_probs, value) == (Categorical(logits).logits, value.squeeze(-1))."""
    B = x.shape[0]
    b_pad8 = _round_up(B, 8)
    if b_pad8 >= 16:
        # Ensure a >=2-step grid so ("parallel",) splits the batch across both
        # v7x TensorCores; otherwise fall back to a single minimal tile.
        tb = min(tile_b, _round_up(pl.cdiv(b_pad8, 2), 8))
    else:
        tb = b_pad8
    b_pad = _round_up(B, tb)
    if b_pad != B:
        x = jnp.pad(x, ((0, b_pad - B), (0, 0)))

    out = pl.pallas_call(
        actor_critic_kernel,
        out_shape=jax.ShapeDtypeStruct((b_pad, PW), jnp.float32),
        grid=(b_pad // tb,),
        in_specs=[
            pl.BlockSpec((tb, OBS), lambda i: (i, 0)),        # batch-tiled obs stream
            pl.BlockSpec((W_ROWS, PW), lambda i: (0, 0)),     # packed weights, VMEM-resident
            pl.BlockSpec((S_ROWS, PW), lambda i: (0, 0)),     # stats matrices + f32 vectors
        ],
        out_specs=pl.BlockSpec((tb, PW), lambda i: (i, 0)),   # lane-dense output slab
        compiler_params=pltpu.CompilerParams(
            dimension_semantics=("parallel",)),               # megacore sharding on v7x
    )(x, wbuf, sbuf)

    logp = out[:B, :NA]
    value = out[:B, NA]
    return logp, value


# ----------------------------- parameter setup --------------------------------
def _init_linear(key, fan_in, fan_out):
    """Deterministic PyTorch-style U(-1/sqrt(fan_in), 1/sqrt(fan_in)) init."""
    kw, kb = jax.random.split(key)
    bound = 1.0 / math.sqrt(fan_in)
    w = jax.random.uniform(kw, (fan_in, fan_out), jnp.float32, -bound, bound)
    b = jax.random.uniform(kb, (1, fan_out), jnp.float32, -bound, bound)
    return w, b


def make_params(key):
    keys = jax.random.split(key, 6)
    p = {}
    p["w1"], p["b1"] = _init_linear(keys[0], OBS, H1)
    p["g1"], p["be1"] = jnp.ones((1, H1), jnp.float32), jnp.zeros((1, H1), jnp.float32)
    p["w2"], p["b2"] = _init_linear(keys[1], H1, H2)
    p["g2"], p["be2"] = jnp.ones((1, H2), jnp.float32), jnp.zeros((1, H2), jnp.float32)
    p["wa"], p["ba"] = _init_linear(keys[2], H2, HA)
    p["ga"], p["bea"] = jnp.ones((1, HA), jnp.float32), jnp.zeros((1, HA), jnp.float32)
    p["wc"], p["bc"] = _init_linear(keys[3], H2, HC)
    p["gc"], p["bec"] = jnp.ones((1, HC), jnp.float32), jnp.zeros((1, HC), jnp.float32)
    p["wl"], p["bl"] = _init_linear(keys[4], HA, NA)
    p["wv"], p["bv"] = _init_linear(keys[5], HC, 1)
    return p


def pack_weights(p, dtype=jnp.float32):
    """Pack all weight matrices into one (W_ROWS, PW) buffer (f32 or bf16)."""
    buf = np.zeros((W_ROWS, PW), np.float32)
    buf[R_W1:R_W1 + OBS, 0:H1] = np.asarray(p["w1"])
    buf[R_W2:R_W2 + H1, 0:H2] = np.asarray(p["w2"])
    buf[R_WB:R_WB + H2, 0:HA] = np.asarray(p["wa"])
    buf[R_WB:R_WB + H2, HA:HA + HC] = np.asarray(p["wc"])
    buf[R_WH:R_WH + HA, 0:NA] = np.asarray(p["wl"])                      # logits block
    buf[R_WH + HA:R_WH + HA + HC, NA:NA + 1] = np.asarray(p["wv"])       # value block
    return jnp.asarray(buf, dtype=dtype)


def pack_stats_vectors(p):
    """Pack LN reduction matrices, lse sum matrix and all bias/gamma/beta rows (f32)."""
    buf = np.zeros((S_ROWS, PW), np.float32)
    # trunk LN reduction matrix (all entries 1/64 -> mean/var broadcast over 64 lanes)
    buf[R_S64:R_S64 + H1, 0:H1] = 1.0 / H1
    # branch block-diagonal reduction matrix (per-half mean/var, already broadcast)
    buf[R_SBLK:R_SBLK + HA, 0:HA] = 1.0 / HA
    buf[R_SBLK + HA:R_SBLK + HA + HC, HA:HA + HC] = 1.0 / HC
    # logsumexp column-sum matrix: only the NA logit columns contribute
    buf[R_SSUM:R_SSUM + NA, 0:PW] = 1.0
    # vector rows (kept f32 on the bf16-weight path)
    for row, arr in [(V_B1, p["b1"]), (V_G1, p["g1"]), (V_BE1, p["be1"]),
                     (V_B2, p["b2"]), (V_G2, p["g2"]), (V_BE2, p["be2"])]:
        a = np.asarray(arr).reshape(-1)
        buf[R_VEC + row, 0:a.size] = a
    for row, a_arr, c_arr in [(V_BB, p["ba"], p["bc"]),
                              (V_GB, p["ga"], p["gc"]),
                              (V_BEB, p["bea"], p["bec"])]:
        buf[R_VEC + row, 0:HA] = np.asarray(a_arr).reshape(-1)
        buf[R_VEC + row, HA:HA + HC] = np.asarray(c_arr).reshape(-1)
    buf[R_VEC + V_BH, 0:NA] = np.asarray(p["bl"]).reshape(-1)
    buf[R_VEC + V_BH, NA] = float(np.asarray(p["bv"]).reshape(-1)[0])
    return jnp.asarray(buf, jnp.float32)


# ------------------------------- reference ------------------------------------
def reference_forward(x, p):
    HI = jax.lax.Precision.HIGHEST

    def dot(a, b):
        return jnp.dot(a, b, precision=HI)

    def ln(h, g, b):
        mu = jnp.mean(h, axis=-1, keepdims=True)
        var = jnp.mean(jnp.square(h - mu), axis=-1, keepdims=True)
        return (h - mu) / jnp.sqrt(var + _LN_EPS) * g + b

    h = jnp.tanh(ln(dot(x, p["w1"]) + p["b1"], p["g1"], p["be1"]))
    h = jnp.tanh(ln(dot(h, p["w2"]) + p["b2"], p["g2"], p["be2"]))
    a = jnp.tanh(ln(dot(h, p["wa"]) + p["ba"], p["ga"], p["bea"]))
    c = jnp.tanh(ln(dot(h, p["wc"]) + p["bc"], p["gc"], p["bec"]))
    logits = dot(a, p["wl"]) + p["bl"]
    logp = jax.nn.log_softmax(logits, axis=-1)
    value = (dot(c, p["wv"]) + p["bv"])[:, 0]
    return logp, value


if __name__ == "__main__":
    key = jax.random.PRNGKey(0)
    kx, kx2, kp = jax.random.split(key, 3)

    params = make_params(kp)
    sbuf = pack_stats_vectors(params)
    wbuf_f32 = pack_weights(params, jnp.float32)

    # ---- small-shape correctness check (f32 weights) -------------------------
    B = 2
    x = jax.random.normal(kx, (B, OBS), jnp.float32)
    logp, value = actor_critic_forward(x, wbuf_f32, sbuf)
    jax.block_until_ready((logp, value))
    ref_logp, ref_value = reference_forward(x, params)
    np.testing.assert_allclose(np.asarray(logp), np.asarray(ref_logp), rtol=1e-4, atol=1e-4)
    np.testing.assert_allclose(np.asarray(value), np.asarray(ref_value), rtol=1e-4, atol=1e-4)

    # ---- multi-tile grid (padding + >=2-step grid for v7x megacore) ---------
    B2 = 250
    x2 = jax.random.normal(kx2, (B2, OBS), jnp.float32)
    logp2, value2 = actor_critic_forward(x2, wbuf_f32, sbuf)
    jax.block_until_ready((logp2, value2))
    ref_logp2, ref_value2 = reference_forward(x2, params)
    np.testing.assert_allclose(np.asarray(logp2), np.asarray(ref_logp2), rtol=1e-4, atol=1e-4)
    np.testing.assert_allclose(np.asarray(value2), np.asarray(ref_value2), rtol=1e-4, atol=1e-4)

    # ---- bf16 weight path (biases / LN params / stats stay f32) -------------
    wbuf_bf16 = pack_weights(params, jnp.bfloat16)
    logp16, value16 = actor_critic_forward(x, wbuf_bf16, sbuf)
    jax.block_until_ready((logp16, value16))
    np.testing.assert_allclose(np.asarray(logp16), np.asarray(ref_logp), rtol=0, atol=1e-1)
    np.testing.assert_allclose(np.asarray(value16), np.asarray(ref_value), rtol=0, atol=1e-1)

    # TODO(synk): torch.distributions.Categorical sampling / log_prob / entropy are
    # host-side distribution utilities and are not implemented in the kernel; the
    # kernel returns the normalized log-probs (== Categorical.logits) and the value.

    print("KERNEL_OK")
</pallas_src>

<mosaic_0001>
module attributes {stable_mosaic.version = 11 : i64} {
  func.func @actor_critic_kernel(%arg0: i32, %arg1: memref<8x8xf32, #tpu.memory_space<vmem>>, %arg2: memref<200x128xf32, #tpu.memory_space<vmem>>, %arg3: memref<272x128xf32, #tpu.memory_space<vmem>>, %arg4: memref<8x128xf32, #tpu.memory_space<vmem>>) attributes {dimension_semantics = [#tpu.dimension_semantics<parallel>], iteration_bounds = array<i64: 1>, scalar_prefetch = 0 : i64, scratch_operands = 0 : i64, tpu.core_type = #tpu.core_type<tc>, window_params = [{transform_indices = @transform_0, window_bounds = array<i64: 8, 8>}, {pipeline_mode = #tpu.pipeline_mode<synchronous>, transform_indices = @transform_1, window_bounds = array<i64: 200, 128>}, {pipeline_mode = #tpu.pipeline_mode<synchronous>, transform_indices = @transform_2, window_bounds = array<i64: 272, 128>}, {transform_indices = @transform_3, window_bounds = array<i64: 8, 128>}]} {
    %c0 = arith.constant 0 : index
    %c0_0 = arith.constant 0 : index
    %0 = vector.load %arg1[%c0, %c0_0] : memref<8x8xf32, #tpu.memory_space<vmem>>, vector<8x8xf32>
    %c0_1 = arith.constant 0 : index
    %c0_2 = arith.constant 0 : index
    %1 = vector.load %arg3[%c0_1, %c0_2] : memref<272x128xf32, #tpu.memory_space<vmem>>, vector<64x64xf32>
    %c64 = arith.constant 64 : index
    %c0_3 = arith.constant 0 : index
    %2 = vector.load %arg3[%c64, %c0_3] : memref<272x128xf32, #tpu.memory_space<vmem>>, vector<64x64xf32>
    %c128 = arith.constant 128 : index
    %c0_4 = arith.constant 0 : index
    %3 = vector.load %arg3[%c128, %c0_4] : memref<272x128xf32, #tpu.memory_space<vmem>>, vector<128x128xf32>
    %c0_5 = arith.constant 0 : index
    %c0_6 = arith.constant 0 : index
    %4 = vector.load %arg2[%c0_5, %c0_6] : memref<200x128xf32, #tpu.memory_space<vmem>>, vector<8x64xf32>
    %cst = arith.constant dense<0.000000e+00> : vector<8x64xf32>
    %5 = tpu.matmul %0, %4, %cst {dimension_numbers = #tpu.dot_dimension_numbers<[1], [0], [0], [1], [0, 0, 1, 1], [], []>, precision = #tpu.contract_precision<fp32>} : vector<8x8xf32>, vector<8x64xf32>, vector<8x64xf32> -> vector<8x64xf32>
    %c256 = arith.constant 256 : index
    %c0_7 = arith.constant 0 : index
    %6 = vector.load %arg3[%c256, %c0_7] : memref<272x128xf32, #tpu.memory_space<vmem>>, vector<1x64xf32>
    %7 = vector.broadcast %6 : vector<1x64xf32> to vector<8x64xf32>
    %8 = arith.addf %5, %7 : vector<8x64xf32>
    %cst_8 = arith.constant dense<0.000000e+00> : vector<8x64xf32>
    %9 = tpu.matmul %8, %1, %cst_8 {dimension_numbers = #tpu.dot_dimension_numbers<[1], [0], [0], [1], [0, 0, 1, 1], [], []>, precision = #tpu.contract_precision<fp32>} : vector<8x64xf32>, vector<64x64xf32>, vector<8x64xf32> -> vector<8x64xf32>
    %10 = arith.subf %8, %9 : vector<8x64xf32>
    %11 = arith.mulf %10, %10 : vector<8x64xf32>
    %cst_9 = arith.constant dense<0.000000e+00> : vector<8x64xf32>
    %12 = tpu.matmul %11, %1, %cst_9 {dimension_numbers = #tpu.dot_dimension_numbers<[1], [0], [0], [1], [0, 0, 1, 1], [], []>, precision = #tpu.contract_precision<fp32>} : vector<8x64xf32>, vector<64x64xf32>, vector<8x64xf32> -> vector<8x64xf32>
    %cst_10 = arith.constant 9.99999974E-6 : f32
    %13 = vector.broadcast %cst_10 : f32 to vector<8x64xf32>
    %14 = arith.addf %12, %13 : vector<8x64xf32>
    %15 = math.rsqrt %14 : vector<8x64xf32>
    %16 = arith.mulf %10, %15 : vector<8x64xf32>
    %c257 = arith.constant 257 : index
    %c0_11 = arith.constant 0 : index
    %17 = vector.load %arg3[%c257, %c0_11] : memref<272x128xf32, #tpu.memory_space<vmem>>, vector<1x64xf32>
    %18 = vector.broadcast %17 : vector<1x64xf32> to vector<8x64xf32>
    %19 = arith.mulf %16, %18 : vector<8x64xf32>
    %c258 = arith.constant 258 : index
    %c0_12 = arith.constant 0 : index
    %20 = vector.load %arg3[%c258, %c0_12] : memref<272x128xf32, #tpu.memory_space<vmem>>, vector<1x64xf32>
    %21 = vector.broadcast %20 : vector<1x64xf32> to vector<8x64xf32>
    %22 = arith.addf %19, %21 : vector<8x64xf32>
    %23 = math.tanh %22 : vector<8x64xf32>
    %c8 = arith.constant 8 : index
    %c0_13 = arith.constant 0 : index
    %24 = vector.load %arg2[%c8, %c0_13] : memref<200x128xf32, #tpu.memory_space<vmem>>, vector<64x64xf32>
    %cst_14 = arith.constant dense<0.000000e+00> : vector<8x64xf32>
    %25 = tpu.matmul %23, %24, %cst_14 {dimension_numbers = #tpu.dot_dimension_numbers<[1], [0], [0], [1], [0, 0, 1, 1], [], []>, precision = #tpu.contract_precision<fp32>} : vector<8x64xf32>, vector<64x64xf32>, vector<8x64xf32> -> vector<8x64xf32>
    %c259 = arith.constant 259 : index
    %c0_15 = arith.constant 0 : index
    %26 = vector.load %arg3[%c259, %c0_15] : memref<272x128xf32, #tpu.memory_space<vmem>>, vector<1x64xf32>
    %27 = vector.broadcast %26 : vector<1x64xf32> to vector<8x64xf32>
    %28 = arith.addf %25, %27 : vector<8x64xf32>
    %cst_16 = arith.constant dense<0.000000e+00> : vector<8x64xf32>
    %29 = tpu.matmul %28, %1, %cst_16 {dimension_numbers = #tpu.dot_dimension_numbers<[1], [0], [0], [1], [0, 0, 1, 1], [], []>, precision = #tpu.contract_precision<fp32>} : vector<8x64xf32>, vector<64x64xf32>, vector<8x64xf32> -> vector<8x64xf32>
    %30 = arith.subf %28, %29 : vector<8x64xf32>
    %31 = arith.mulf %30, %30 : vector<8x64xf32>
    %cst_17 = arith.constant dense<0.000000e+00> : vector<8x64xf32>
    %32 = tpu.matmul %31, %1, %cst_17 {dimension_numbers = #tpu.dot_dimension_numbers<[1], [0], [0], [1], [0, 0, 1, 1], [], []>, precision = #tpu.contract_precision<fp32>} : vector<8x64xf32>, vector<64x64xf32>, vector<8x64xf32> -> vector<8x64xf32>
    %cst_18 = arith.constant 9.99999974E-6 : f32
    %33 = vector.broadcast %cst_18 : f32 to vector<8x64xf32>
    %34 = arith.addf %32, %33 : vector<8x64xf32>
    %35 = math.rsqrt %34 : vector<8x64xf32>
    %36 = arith.mulf %30, %35 : vector<8x64xf32>
    %c260 = arith.constant 260 : index
    %c0_19 = arith.constant 0 : index
    %37 = vector.load %arg3[%c260, %c0_19] : memref<272x128xf32, #tpu.memory_space<vmem>>, vector<1x64xf32>
    %38 = vector.broadcast %37 : vector<1x64xf32> to vector<8x64xf32>
    %39 = arith.mulf %36, %38 : vector<8x64xf32>
    %c261 = arith.constant 261 : index
    %c0_20 = arith.constant 0 : index
    %40 = vector.load %arg3[%c261, %c0_20] : memref<272x128xf32, #tpu.memory_space<vmem>>, vector<1x64xf32>
    %41 = vector.broadcast %40 : vector<1x64xf32> to vector<8x64xf32>
    %42 = arith.addf %39, %41 : vector<8x64xf32>
    %43 = math.tanh %42 : vector<8x64xf32>
    %c72 = arith.constant 72 : index
    %c0_21 = arith.constant 0 : index
    %44 = vector.load %arg2[%c72, %c0_21] : memref<200x128xf32, #tpu.memory_space<vmem>>, vector<64x64xf32>
    %cst_22 = arith.constant dense<0.000000e+00> : vector<8x64xf32>
    %45 = tpu.matmul %43, %44, %cst_22 {dimension_numbers = #tpu.dot_dimension_numbers<[1], [0], [0], [1], [0, 0, 1, 1], [], []>, precision = #tpu.contract_precision<fp32>} : vector<8x64xf32>, vector<64x64xf32>, vector<8x64xf32> -> vector<8x64xf32>
    %c262 = arith.constant 262 : index
    %c0_23 = arith.constant 0 : index
    %46 = vector.load %arg3[%c262, %c0_23] : memref<272x128xf32, #tpu.memory_space<vmem>>, vector<1x64xf32>
    %47 = vector.broadcast %46 : vector<1x64xf32> to vector<8x64xf32>
    %48 = arith.addf %45, %47 : vector<8x64xf32>
    %cst_24 = arith.constant dense<0.000000e+00> : vector<8x64xf32>
    %49 = tpu.matmul %48, %2, %cst_24 {dimension_numbers = #tpu.dot_dimension_numbers<[1], [0], [0], [1], [0, 0, 1, 1], [], []>, precision = #tpu.contract_precision<fp32>} : vector<8x64xf32>, vector<64x64xf32>, vector<8x64xf32> -> vector<8x64xf32>
    %50 = arith.subf %48, %49 : vector<8x64xf32>
    %51 = arith.mulf %50, %50 : vector<8x64xf32>
    %cst_25 = arith.constant dense<0.000000e+00> : vector<8x64xf32>
    %52 = tpu.matmul %51, %2, %cst_25 {dimension_numbers = #tpu.dot_dimension_numbers<[1], [0], [0], [1], [0, 0, 1, 1], [], []>, precision = #tpu.contract_precision<fp32>} : vector<8x64xf32>, vector<64x64xf32>, vector<8x64xf32> -> vector<8x64xf32>
    %cst_26 = arith.constant 9.99999974E-6 : f32
    %53 = vector.broadcast %cst_26 : f32 to vector<8x64xf32>
    %54 = arith.addf %52, %53 : vector<8x64xf32>
    %55 = math.rsqrt %54 : vector<8x64xf32>
    %56 = arith.mulf %50, %55 : vector<8x64xf32>
    %c263 = arith.constant 263 : index
    %c0_27 = arith.constant 0 : index
    %57 = vector.load %arg3[%c263, %c0_27] : memref<272x128xf32, #tpu.memory_space<vmem>>, vector<1x64xf32>
    %58 = vector.broadcast %57 : vector<1x64xf32> to vector<8x64xf32>
    %59 = arith.mulf %56, %58 : vector<8x64xf32>
    %c264 = arith.constant 264 : index
    %c0_28 = arith.constant 0 : index
    %60 = vector.load %arg3[%c264, %c0_28] : memref<272x128xf32, #tpu.memory_space<vmem>>, vector<1x64xf32>
    %61 = vector.broadcast %60 : vector<1x64xf32> to vector<8x64xf32>
    %62 = arith.addf %59, %61 : vector<8x64xf32>
    %63 = math.tanh %62 : vector<8x64xf32>
    %c136 = arith.constant 136 : index
    %c0_29 = arith.constant 0 : index
    %64 = vector.load %arg2[%c136, %c0_29] : memref<200x128xf32, #tpu.memory_space<vmem>>, vector<64x128xf32>
    %cst_30 = arith.constant dense<0.000000e+00> : vector<8x128xf32>
    %65 = tpu.matmul %63, %64, %cst_30 {dimension_numbers = #tpu.dot_dimension_numbers<[1], [0], [0], [1], [0, 0, 1, 1], [], []>, precision = #tpu.contract_precision<fp32>} : vector<8x64xf32>, vector<64x128xf32>, vector<8x128xf32> -> vector<8x128xf32>
    %c265 = arith.constant 265 : index
    %c0_31 = arith.constant 0 : index
    %66 = vector.load %arg3[%c265, %c0_31] : memref<272x128xf32, #tpu.memory_space<vmem>>, vector<1x128xf32>
    %67 = vector.broadcast %66 : vector<1x128xf32> to vector<8x128xf32>
    %68 = arith.addf %65, %67 : vector<8x128xf32>
    %69 = tpu.iota {dimensions = array<i32: 1>} : vector<8x128xi32>
    %c4_i32 = arith.constant 4 : i32
    %70 = vector.broadcast %c4_i32 : i32 to vector<8x128xi32>
    %71 = arith.cmpi slt, %69, %70 : vector<8x128xi32>
    %cst_32 = arith.constant 0xFF800000 : f32
    %72 = vector.broadcast %cst_32 : f32 to vector<8x128xf32>
    %73 = arith.select %71, %68, %72 : vector<8x128xi1>, vector<8x128xf32>
    %cst_33 = arith.constant dense<0xFF800000> : vector<8xf32>
    %74 = vector.multi_reduction <maximumf>, %73, %cst_33 [1] : vector<8x128xf32> to vector<8xf32>
    %75 = vector.shape_cast %74 : vector<8xf32> to vector<8x1xf32>
    %76 = vector.broadcast %75 : vector<8x1xf32> to vector<8x128xf32>
    %77 = arith.subf %73, %76 : vector<8x128xf32>
    %78 = math.exp %77 : vector<8x128xf32>
    %cst_34 = arith.constant dense<0.000000e+00> : vector<8x128xf32>
    %79 = tpu.matmul %78, %3, %cst_34 {dimension_numbers = #tpu.dot_dimension_numbers<[1], [0], [0], [1], [0, 0, 1, 1], [], []>, precision = #tpu.contract_precision<fp32>} : vector<8x128xf32>, vector<128x128xf32>, vector<8x128xf32> -> vector<8x128xf32>
    %80 = math.log %79 : vector<8x128xf32>
    %81 = vector.broadcast %75 : vector<8x1xf32> to vector<8x128xf32>
    %82 = arith.addf %81, %80 : vector<8x128xf32>
    %83 = arith.subf %68, %82 : vector<8x128xf32>
    %84 = arith.select %71, %83, %68 : vector<8x128xi1>, vector<8x128xf32>
    %c0_35 = arith.constant 0 : index
    %c0_36 = arith.constant 0 : index
    %85 = vector.load %arg4[%c0_35, %c0_36] : memref<8x128xf32, #tpu.memory_space<vmem>>, vector<8x128xf32>
    tpu.vector_store %arg4[%c0_35, %c0_36], %84 {strides = array<i32>} : memref<8x128xf32, #tpu.memory_space<vmem>>, vector<8x128xf32>,
    return
  }
  func.func @transform_0(%arg0: i32) -> (i32, i32) {
    %c0_i32 = arith.constant 0 : i32
    %c0_i32_0 = arith.constant 0 : i32
    return %arg0, %c0_i32 : i32, i32
  }
  func.func @transform_1(%arg0: i32) -> (i32, i32) {
    %c0_i32 = arith.constant 0 : i32
    %c0_i32_0 = arith.constant 0 : i32
    %c0_i32_1 = arith.constant 0 : i32
    return %c0_i32, %c0_i32_0 : i32, i32
  }
  func.func @transform_2(%arg0: i32) -> (i32, i32) {
    %c0_i32 = arith.constant 0 : i32
    %c0_i32_0 = arith.constant 0 : i32
    %c0_i32_1 = arith.constant 0 : i32
    return %c0_i32, %c0_i32_0 : i32, i32
  }
  func.func @transform_3(%arg0: i32) -> (i32, i32) {
    %c0_i32 = arith.constant 0 : i32
    %c0_i32_0 = arith.constant 0 : i32
    return %arg0, %c0_i32 : i32, i32
  }
}

</mosaic_0001>

<bundles_post_ra>
// kernel: tpu_custom_call.1
= control target key start
LH: loop header
LB: loop body
LE: loop exit
PB: predicated region body
PF: predicated region fallthrough
CT: control target
= control target key end

     0   :  { %8 = vsyncpa [#allocation3], 0  ;;  %s10175_s0 = inlined_call_operand.hbm [shape: f32[8,8], index: 0, kind: input, shape index: {}]   ;;  %s10176_s1 = inlined_call_operand.hbm [shape: f32[200,128], index: 1, kind: input, shape index: {}]   ;;  %s10177_s2 = inlined_call_operand.hbm [shape: f32[272,128], index: 2, kind: input, shape index: {}]   ;;  %s10178_s3 = inlined_call_operand.hbm [shape: f32[8,128], index: 3, kind: output, shape index: {}]  }
   0x1   :  { %9 = vsyncpa [#allocation6], 0 }
   0x2   :  { %10 = vsyncpa [#allocation4], 0  ;;  %s9069_s12 = smov [#allocation5]   ;;  %s8975_s16 = scalar_lea.hbm %s10176_s1, 3200 }
   0x3   :  { %s26_s13 = sshll.u32 %s9069_s12, 4  ;;  %p8976_p0 = scmp.ne.s32.totalorder %s10176_s1, %s8975_s16  ;;  %s27_s13 = int_to_ptr.vmem [resolvable:$true] %s26_s13 }
   0x4   :  { %p8979_p1 = scmp.lt.u32.totalorder %s8975_s16, %s10176_s1 }
   0x6   :  { %p8981_p2 = pnand %p8979_p1, %p8976_p0 }
   0x8   :  { %8984 = shalt.err (!%p8981_p2)
}
   0x9   :  { %s8985_s21 = scalar_lea.vmem %s27_s13, 3200  ;;  %p8990_p4 = scmp.lt.s32.totalorder %s27_s13, %s27_s13 }
   0xa   :  { %p8986_p3 = scmp.ne.s32.totalorder %s27_s13, %s8985_s21  ;;  %p8991_p5 = scmp.lt.s32.totalorder %s8985_s21, %s8985_s21 }
   0xc   :  { %p8992_p6 = por %p8991_p5, %p8990_p4 }
   0xe   :  { %p8993_p7 = pnand %p8992_p6, %p8986_p3 }
  0x10   :  { %8996 = shalt.err (!%p8993_p7)
}
  0x11   :  { %s9070_s22 = smov 128   ;;  %s9071_s23 = smov 8  }
  0x12   :  { %32 = dma.hbm_to_vmem [thread:$0]  %s10176_s1, 3200, %s27_s13, [#allocation6], %s9070_s22, %s9070_s22, %s9071_s23  }
  0x13   :  { %s9072_s26 = smov [#allocation2]   ;;  %s9073_s28 = smov [#allocation7]  }
  0x14   :  { %s17_s27 = sshll.u32 %s9072_s26, 4  ;;  %s38_s29 = sshll.u32 %s9073_s28, 4  ;;  %s18_s27 = int_to_ptr.vmem [resolvable:$true] %s17_s27  ;;  %s39_s29 = int_to_ptr.vmem [resolvable:$true] %s38_s29 }
  0x15   :  { %s8997_s5 = scalar_lea.hbm %s10175_s0, 128 }
  0x16   :  { %p8998_p8 = scmp.ne.s32.totalorder %s10175_s0, %s8997_s5  ;;  %p9001_p9 = scmp.lt.u32.totalorder %s8997_s5, %s10175_s0 }
  0x18   :  { %p9003_p10 = pnand %p9001_p9, %p8998_p8 }
  0x1a   :  { %9006 = shalt.err (!%p9003_p10)
}
  0x1b   :  { %s9007_s1 = scalar_lea.vmem %s18_s27, 128  ;;  %p9012_p12 = scmp.lt.s32.totalorder %s18_s27, %s18_s27 }
  0x1c   :  { %p9008_p11 = scmp.ne.s32.totalorder %s18_s27, %s9007_s1  ;;  %p9013_p13 = scmp.lt.s32.totalorder %s9007_s1, %s9007_s1 }
  0x1e   :  { %p9014_p0 = por %p9013_p13, %p9012_p12 }
  0x20   :  { %p9015_p1 = pnand %p9014_p0, %p9008_p11 }
  0x22   :  { %9018 = shalt.err (!%p9015_p1)
}
  0x23   :  { %20 = dma.hbm_to_vmem [thread:$0]  %s10175_s0, 128, %s18_s27, [#allocation3]  }
  0x24   :  { %s9019_s14 = scalar_lea.hbm %s10177_s2, 4352 }
  0x25   :  { %p9020_p2 = scmp.ne.s32.totalorder %s10177_s2, %s9019_s14  ;;  %p9023_p3 = scmp.lt.u32.totalorder %s9019_s14, %s10177_s2 }
  0x27   :  { %p9025_p4 = pnand %p9023_p3, %p9020_p2 }
  0x29   :  { %9028 = shalt.err (!%p9025_p4)
}
  0x2a   :  { %s9029_s19 = scalar_lea.vmem %s39_s29, 4352  ;;  %p9034_p6 = scmp.lt.s32.totalorder %s39_s29, %s39_s29 }
  0x2b   :  { %p9030_p5 = scmp.ne.s32.totalorder %s39_s29, %s9029_s19  ;;  %p9035_p7 = scmp.lt.s32.totalorder %s9029_s19, %s9029_s19 }
  0x2d   :  { %p9036_p8 = por %p9035_p7, %p9034_p6 }
  0x2f   :  { %p9037_p9 = pnand %p9036_p8, %p9030_p5 }
  0x31   :  { %9040 = shalt.err (!%p9037_p9)
}
  0x32   :  { %44 = dma.hbm_to_vmem [thread:$0]  %s10177_s2, 4352, %s39_s29, [#allocation6], %s9070_s22, %s9070_s22, %s9071_s23  }
  0x33   :  { %9063 = dma.done.wait [#allocation3], 128  }
  0x34   :  { %9064 = vsyncadd [#allocation3], 4294967168 }
  0x35   :  { %9065 = dma.done.wait [#allocation6], 7552  }
  0x36   :  { %9066 = vsyncadd [#allocation6], 4294959744  ;;  %v9074_v0 = vmov 0.0   ;;  %vm9075_vm0 = vmmov 0   ;;  %v9076_v1 = vmov 0.0|0.0   ;;  %vm93_vm1 = vcmask 64512  }
  0x37   :  { %6776 = vmatprep.subr.mxu0 %v9074_v0  ;;  %6778 = vmatprep.mubr.msk.f32.mxu0 %vm9075_vm0, %v9074_v0  ;;  %v87_v2 = vld [vmem:[#allocation5] sm:$0xff]  ;;  %v54_v3 = vld [vmem:[#allocation2] sm:$0xff]  ;;  %v9146_v4 = vld [vmem:[#allocation7] sm:$0xff]  ;;  %vm543_vm2 = vcmask 523264   ;;  %s9077_s2 = smov [#allocation8]  }
  0x38   :  { %8042 = vmatprep.subr.bf16.mxu1 %v9076_v1  ;;  %6822 = vmatprep.mubr.msk.f32.mxu1 %vm9075_vm0, %v9074_v0  ;;  %v98_v5 = vand.u32 4294901760, %v87_v2  ;;  %v95_v6 = vsel %vm93_vm1, %v54_v3, 0  ;;  %v9148_v7 = vld [vmem:[#allocation7 + $0x8] sm:$0xff]  ;;  %v548_v8 = vand.u32 4294901760, %v9146_v4  ;;  %v57_v20 = vld [vmem:[#allocation7 + $0x10] sm:$0xff]  ;;  %v58_v21 = vld [vmem:[#allocation7 + $0x18] sm:$0xff] }
  0x39   :  { %v163_v9 = vand.u32 4294901760, %v95_v6  ;;  %v551_v10 = vand.u32 4294901760, %v9148_v7  ;;  %v554_v22 = vand.u32 4294901760, %v57_v20  ;;  %v557_v23 = vand.u32 4294901760, %v58_v21  ;;  %v59_v25 = vld [vmem:[#allocation7 + $0x20] sm:$0xff]  ;;  %v60_v26 = vld [vmem:[#allocation7 + $0x28] sm:$0xff] }
  0x3a   :  { %6777 = vmatpush3.msra.mxu0 %v98_v5  ;;  %v175_v11 = vsub.f32 %v87_v2, %v98_v5  ;;  %v560_v27 = vand.u32 4294901760, %v59_v25  ;;  %v563_v28 = vand.u32 4294901760, %v60_v26  ;;  %v61_v30 = vld [vmem:[#allocation7 + $0x30] sm:$0xff]  ;;  %v62_v31 = vld [vmem:[#allocation7 + $0x38] sm:$0xff]  ;;  %s6156_s21 = sshll.u32 %s9077_s2, 4  ;;  %s6157_s21 = int_to_ptr.vmem [resolvable:$true] %s6156_s21 }
  0x3b   :  { %6781 = vmatprep.subr.mxu0 %v9074_v0  ;;  %v164_v12 = vsub.f32 %v95_v6, %v163_v9  ;;  %v9157_v13 = vpack.c.bf16 %v551_v10, %v548_v8  ;;  %v9180_v24 = vpack.c.bf16 %v557_v23, %v554_v22  ;;  %v566_v32 = vand.u32 4294901760, %v61_v30  ;;  %s9041_s22 = scalar_lea.vmem %s6157_s21, 128  ;;  %p9046_p11 = scmp.lt.s32.totalorder %s6157_s21, %s6157_s21 }
  0x3c   :  { %v176_v14 = vand.u32 4294901760, %v175_v11  ;;  %v9186_v29 = vpack.c.bf16 %v563_v28, %v560_v27  ;;  %v569_v33 = vand.u32 4294901760, %v62_v31  ;;  %v646_v35 = vsub.f32 %v57_v20, %v554_v22  ;;  %p9042_p10 = scmp.ne.s32.totalorder %s6157_s21, %s9041_s22  ;;  %p9047_p12 = scmp.lt.s32.totalorder %s9041_s22, %s9041_s22 }
  0x3d   :  { %v165_v15 = vand.u32 4294901760, %v164_v12  ;;  %8044 = vmatpush3.bf16.msra.mxu1 %v9157_v13  ;;  %v653_v36 = vsub.f32 %v58_v21, %v557_v23  ;;  %v660_v41 = vsub.f32 %v59_v25, %v560_v27  ;;  %v667_v42 = vsub.f32 %v60_v26, %v563_v28 }
  0x3e   :  { %v177_v16 = vsub.f32 %v175_v11, %v176_v14  ;;  %8045 = vmatprep.subr.bf16.mxu1 %v9076_v1  ;;  %v9192_v34 = vpack.c.bf16 %v569_v33, %v566_v32  ;;  %v647_v37 = vand.u32 4294901760, %v646_v35  ;;  %v674_v50 = vsub.f32 %v61_v30, %v566_v32  ;;  %p9048_p13 = por %p9047_p12, %p9046_p11 }
  0x3f   :  { %v166_v17 = vsub.f32 %v164_v12, %v165_v15  ;;  %v654_v38 = vand.u32 4294901760, %v653_v36  ;;  %v661_v45 = vand.u32 4294901760, %v660_v41  ;;  %v668_v46 = vand.u32 4294901760, %v667_v42 }
  0x40   :  { %v178_v18 = vand.u32 4294901760, %v177_v16  ;;  %v648_v39 = vsub.f32 %v646_v35, %v647_v37  ;;  %v681_v51 = vsub.f32 %v62_v31, %v569_v33  ;;  %v675_v54 = vand.u32 4294901760, %v674_v50  ;;  %p9049_p0 = pnand %p9048_p13, %p9042_p10 }
  0x41   :  { %v167_v19 = vand.u32 4294901760, %v166_v17  ;;  %8047 = vmatpush3.bf16.msra.mxu1 %v9180_v24  ;;  %v655_v40 = vsub.f32 %v653_v36, %v654_v38  ;;  %v662_v48 = vsub.f32 %v660_v41, %v661_v45  ;;  %v669_v49 = vsub.f32 %v667_v42, %v668_v46 }
  0x42   :  { %8048 = vmatprep.subr.bf16.mxu1 %v9076_v1  ;;  %v649_v43 = vand.u32 4294901760, %v648_v39  ;;  %v682_v55 = vand.u32 4294901760, %v681_v51  ;;  %v676_v57 = vsub.f32 %v674_v50, %v675_v54  ;;  %v9204_v62 = vpack.c.bf16 %v653_v36, %v646_v35 }
  0x43   :  { %6779 = vmatmul.mubr.f32.vlgmr.msra.gmra.mrb[0].mxu0 %v167_v19  ;;  %v656_v44 = vand.u32 4294901760, %v655_v40  ;;  %v663_v52 = vand.u32 4294901760, %v662_v48  ;;  %v670_v53 = vand.u32 4294901760, %v669_v49  ;;  %v9206_v63 = vpack.c.bf16 %v667_v42, %v660_v41  ;;  %v1641_v41 = vld [vmem:[#allocation5 + $0x8] sm:$0xff]  ;;  %v1642_v42 = vld [vmem:[#allocation5 + $0x10] sm:$0xff] }
  0x44   :  { %6782 = vmatpush3.msra.mxu0 %v178_v18  ;;  %6783 = vmatprep.mubr.msk.f32.mxu0 %vm9075_vm0, %v9074_v0  ;;  %v683_v58 = vsub.f32 %v681_v51, %v682_v55  ;;  %v677_v59 = vand.u32 4294901760, %v676_v57  ;;  %v9208_v2 = vpack.c.bf16 %v681_v51, %v674_v50  ;;  %v9210_v3 = vpack.c.bf16 %v654_v38, %v647_v37  ;;  %v1645_v49 = vld [vmem:[#allocation5 + $0x28] sm:$0xff]  ;;  %v1646_v50 = vld [vmem:[#allocation5 + $0x30] sm:$0xff] }
  0x45   :  { %6786 = vmatprep.subr.mxu0 %v9074_v0  ;;  %8050 = vmatpush3.bf16.msra.mxu1 %v9186_v29  ;;  %v9198_v47 = vpack.c.bf16 %v656_v44, %v649_v43  ;;  %v9200_v56 = vpack.c.bf16 %v670_v53, %v663_v52  ;;  %v9214_v6 = vpack.c.bf16 %v682_v55, %v675_v54  ;;  %v1643_v43 = vld [vmem:[#allocation5 + $0x18] sm:$0xff]  ;;  %v1658_v44 = vand.u32 4294901760, %v1641_v41  ;;  %v1648_v55 = vld [vmem:[#allocation5 + $0x40] sm:$0xff] }
  0x46   :  { %8051 = vmatprep.subr.bf16.mxu1 %v9076_v1  ;;  %v684_v60 = vand.u32 4294901760, %v683_v58  ;;  %v1664_v48 = vand.u32 4294901760, %v1643_v43  ;;  %v1670_v52 = vand.u32 4294901760, %v1645_v49  ;;  %v1673_v53 = vand.u32 4294901760, %v1646_v50  ;;  %v1647_v54 = vld [vmem:[#allocation5 + $0x38] sm:$0xff] }
  0x47   :  { %v9352_v58 = vsub.f32 %v1641_v41, %v1658_v44 }
  0x48   :  { %v9202_v61 = vpack.c.bf16 %v684_v60, %v677_v59  ;;  %v9356_v60 = vsub.f32 %v1643_v43, %v1664_v48 }
  0x49   :  { %8053 = vmatpush3.bf16.msra.mxu1 %v9192_v34 }
  0x4a   :  { %8054 = vmatprep.subr.bf16.mxu1 %v9076_v1 }
  0x4b   :  { %6784 = vmatmul.mubr.f32.vlgmr.msra.gmra.mrb[0].mxu0 %v163_v9 }
  0x4c   :  { %6787 = vmatpush3.msra.mxu0 %v175_v11  ;;  %6788 = vmatprep.mubr.msk.f32.mxu0 %vm9075_vm0, %v9074_v0  ;;  %v639_v11 = vsub.f32 %v9148_v7, %v551_v10 }
  0x4d   :  { %6791 = vmatprep.subr.mxu0 %v9074_v0 }
  0x53   :  { %6789 = vmatmul.mubr.f32.vlgmr.msra.gmra.mrb[0].mxu0 %v164_v12  ;;  %v6166_v12 = vld [vmem:[#allocation7 + $0x100] ss:$0 sm:$0xff] }
  0x54   :  { %6792 = vmatpush3.msra.mxu0 %v98_v5  ;;  %6793 = vmatprep.mubr.msk.f32.mxu0 %vm9075_vm0, %v9074_v0 }
  0x55   :  { %6796 = vmatprep.subr.mxu0 %v9074_v0 }
  0x5b   :  { %6794 = vmatmul.mubr.f32.vlgmr.msra.gmra.mrb[0].mxu0 %v165_v15  ;;  %v640_v15 = vand.u32 4294901760, %v639_v11 }
  0x5c   :  { %6797 = vmatpush3.msra.mxu0 %v176_v14  ;;  %6798 = vmatprep.mubr.msk.f32.mxu0 %vm9075_vm0, %v9074_v0 }
  0x5d   :  { %6801 = vmatprep.subr.mxu0 %v9074_v0  ;;  %v641_v21 = vsub.f32 %v639_v11, %v640_v15 }
  0x63   :  { %6799 = vmatmul.mubr.f32.vlgmr.msra.gmra.mrb[0].mxu0 %v163_v9 }
  0x64   :  { %6802 = vmatpush3.msra.mxu0 %v98_v5  ;;  %6803 = vmatprep.mubr.msk.f32.mxu0 %vm9075_vm0, %v9074_v0  ;;  %v9212_v5 = vpack.c.bf16 %v668_v46, %v661_v45  ;;  %v1661_v45 = vand.u32 4294901760, %v1642_v42  ;;  %v1644_v46 = vld [vmem:[#allocation5 + $0x20] sm:$0xff] }
  0x65   :  { %8114 = vmatprep.subr.bf16.mxu0 %v9076_v1  ;;  %v1667_v51 = vand.u32 4294901760, %v1644_v46 }
  0x66   :  { %v9350_v57 = vpack.c.bf16 %v1661_v45, %v1658_v44  ;;  %v9354_v59 = vsub.f32 %v1642_v42, %v1661_v45 }
  0x6b   :  { %6804 = vmatmul.mubr.f32.vlgmr.msra.gmra.mrb[0].mxu0 %v163_v9  ;;  %v632_v9 = vsub.f32 %v9146_v4, %v548_v8  ;;  %v642_v8 = vand.u32 4294901760, %v641_v21  ;;  %v1743_v21 = vand.u32 4294901760, %v9352_v58 }
  0x6c   :  { %8116 = vmatpush3.bf16.msra.mxu0 %v9157_v13  ;;  %6936 = vmatprep.mubr.msk.f32.mxu0 %vm9075_vm0, %v9074_v0 }
  0x6d   :  { %8117 = vmatprep.subr.bf16.mxu0 %v9076_v1  ;;  %v633_v14 = vand.u32 4294901760, %v632_v9  ;;  %v9237_v27 = vpack.c.bf16 %v639_v11, %v632_v9  ;;  %v9360_v11 = vsub.f32 %v1645_v49, %v1670_v52 }
  0x6f   :  { %v634_v20 = vsub.f32 %v632_v9, %v633_v14  ;;  %v9259_v28 = vpack.c.bf16 %v640_v15, %v633_v14  ;;  %v9358_v9 = vsub.f32 %v1644_v46, %v1667_v51  ;;  %v9365_v14 = vsub.f32 %v1646_v50, %v1673_v53 }
  0x70   :  { %8119 = vmatpush3.bf16.msra.mxu0 %v9180_v24  ;;  %v1676_v15 = vand.u32 4294901760, %v1647_v54 }
  0x71   :  { %8120 = vmatprep.subr.bf16.mxu0 %v9076_v1  ;;  %v635_v4 = vand.u32 4294901760, %v634_v20 }
  0x73   :  { %v9226_v7 = vpack.c.bf16 %v642_v8, %v635_v4 }
  0x74   :  { %8122 = vmatpush3.bf16.msra.mxu0 %v9186_v29 }
  0x75   :  { %8123 = vmatprep.subr.bf16.mxu0 %v9076_v1 }
  0x78   :  { %8125 = vmatpush3.bf16.msra.mxu0 %v9192_v34 }
  0x79   :  { %8126 = vmatprep.subr.bf16.mxu0 %v9076_v1 }
 0x13e   :  { %v539_v16 = vpop.f32.mrb[0].mxu0 }
 0x13f   :  { %v9222_v17 = vadd.f32 %v6166_v12, %v539_v16  ;;  %v6805_v18 = vpop.f32.mrb[1].mxu0  ;;  %v9363_v12 = vpack.c.bf16 %v1667_v51, %v1664_v48  ;;  %v1679_v16 = vand.u32 4294901760, %v1648_v55 }
 0x141   :  { %v545_v19 = vsel %vm543_vm2, %v9222_v17, 0  ;;  %v9370_v18 = vsub.f32 %v1648_v55, %v1679_v16  ;;  %v9377_v20 = vpack.c.bf16 %v1679_v16, %v1676_v15  ;;  %v8217_v55 = vpack.c.bf16 %v9365_v14, %v9360_v11 }
 0x142   :  { %v620_v22 = vand.u32 4294901760, %v545_v19 }
 0x143   :  { %v1792_v45 = vand.u32 4294901760, %v9370_v18 }
 0x144   :  { %v621_v23 = vsub.f32 %v545_v19, %v620_v22  ;;  %v9373_v19 = vpack.c.bf16 %v1673_v53, %v1670_v52  ;;  %v8211_v53 = vpack.c.bf16 %v9354_v59, %v9352_v58 }
 0x145   :  { %v1793_v49 = vsub.f32 %v9370_v18, %v1792_v45 }
 0x146   :  { %v622_v25 = vand.u32 4294901760, %v621_v23 }
 0x147   :  { %v1794_v51 = vand.u32 4294901760, %v1793_v49 }
 0x148   :  { %v623_v26 = vsub.f32 %v621_v23, %v622_v25 }
 0x14a   :  { %v624_v10 = vand.u32 4294901760, %v623_v26  ;;  %v1757_v26 = vand.u32 4294901760, %v9356_v60 }
 0x14c   :  { %6823 = vmatmul.mubr.f32.vlgmr.msra.gmra.mrb[0].mxu1 %v624_v10  ;;  %v1764_v10 = vand.u32 4294901760, %v9358_v9 }
 0x14d   :  { %8056 = vmatpush3.bf16.msra.mxu1 %v9226_v7  ;;  %6841 = vmatprep.mubr.msk.f32.mxu1 %vm9075_vm0, %v9074_v0 }
 0x14e   :  { %8057 = vmatprep.subr.bf16.mxu1 %v9076_v1 }
 0x151   :  { %8059 = vmatpush3.bf16.msra.mxu1 %v9198_v47 }
 0x152   :  { %8060 = vmatprep.subr.bf16.mxu1 %v9076_v1 }
 0x155   :  { %8062 = vmatpush3.bf16.msra.mxu1 %v9200_v56 }
 0x156   :  { %8063 = vmatprep.subr.bf16.mxu1 %v9076_v1 }
 0x159   :  { %8065 = vmatpush3.bf16.msra.mxu1 %v9202_v61 }
 0x15a   :  { %8066 = vmatprep.subr.bf16.mxu1 %v9076_v1 }
 0x15c   :  { %6842 = vmatmul.mubr.f32.vlgmr.msra.gmra.mrb[0].mxu1 %v620_v22 }
 0x15d   :  { %8068 = vmatpush3.bf16.msra.mxu1 %v9237_v27  ;;  %6860 = vmatprep.mubr.msk.f32.mxu1 %vm9075_vm0, %v9074_v0 }
 0x15e   :  { %8069 = vmatprep.subr.bf16.mxu1 %v9076_v1 }
 0x161   :  { %8071 = vmatpush3.bf16.msra.mxu1 %v9204_v62 }
 0x162   :  { %8072 = vmatprep.subr.bf16.mxu1 %v9076_v1 }
 0x165   :  { %8074 = vmatpush3.bf16.msra.mxu1 %v9206_v63 }
 0x166   :  { %8075 = vmatprep.subr.bf16.mxu1 %v9076_v1 }
 0x169   :  { %8077 = vmatpush3.bf16.msra.mxu1 %v9208_v2 }
 0x16a   :  { %8078 = vmatprep.subr.bf16.mxu1 %v9076_v1 }
 0x16c   :  { %6861 = vmatmul.mubr.f32.vlgmr.msra.gmra.mrb[0].mxu1 %v621_v23  ;;  %v1744_v23 = vsub.f32 %v9352_v58, %v1743_v21 }
 0x16d   :  { %8080 = vmatpush3.bf16.msra.mxu1 %v9157_v13  ;;  %6879 = vmatprep.mubr.msk.f32.mxu1 %vm9075_vm0, %v9074_v0 }
 0x16e   :  { %8081 = vmatprep.subr.bf16.mxu1 %v9076_v1  ;;  %v1745_v8 = vand.u32 4294901760, %v1744_v23  ;;  %v8238_v23 = vpack.c.bf16 %v1764_v10, %v1757_v26 }
 0x171   :  { %8083 = vmatpush3.bf16.msra.mxu1 %v9180_v24 }
 0x172   :  { %8084 = vmatprep.subr.bf16.mxu1 %v9076_v1 }
 0x175   :  { %8086 = vmatpush3.bf16.msra.mxu1 %v9186_v29 }
 0x176   :  { %8087 = vmatprep.subr.bf16.mxu1 %v9076_v1 }
 0x179   :  { %8089 = vmatpush3.bf16.msra.mxu1 %v9192_v34 }
 0x17a   :  { %8090 = vmatprep.subr.bf16.mxu1 %v9076_v1 }
 0x17c   :  { %6880 = vmatmul.mubr.f32.vlgmr.msra.gmra.mrb[0].mxu1 %v622_v25 }
 0x17d   :  { %8092 = vmatpush3.bf16.msra.mxu1 %v9259_v28  ;;  %6898 = vmatprep.mubr.msk.f32.mxu1 %vm9075_vm0, %v9074_v0 }
 0x17e   :  { %8093 = vmatprep.subr.bf16.mxu1 %v9076_v1 }
 0x181   :  { %8095 = vmatpush3.bf16.msra.mxu1 %v9210_v3 }
 0x182   :  { %8096 = vmatprep.subr.bf16.mxu1 %v9076_v1 }
 0x185   :  { %8098 = vmatpush3.bf16.msra.mxu1 %v9212_v5 }
 0x186   :  { %8099 = vmatprep.subr.bf16.mxu1 %v9076_v1 }
 0x189   :  { %8101 = vmatpush3.bf16.msra.mxu1 %v9214_v6 }
 0x18a   :  { %8102 = vmatprep.subr.bf16.mxu1 %v9076_v1 }
 0x18c   :  { %6899 = vmatmul.mubr.f32.vlgmr.msra.gmra.mrb[0].mxu1 %v620_v22 }
 0x18d   :  { %8104 = vmatpush3.bf16.msra.mxu1 %v9157_v13  ;;  %6917 = vmatprep.mubr.msk.f32.mxu1 %vm9075_vm0, %v9074_v0 }
 0x18e   :  { %8105 = vmatprep.subr.bf16.mxu1 %v9076_v1 }
 0x191   :  { %8107 = vmatpush3.bf16.msra.mxu1 %v9180_v24 }
 0x192   :  { %8108 = vmatprep.subr.bf16.mxu1 %v9076_v1 }
 0x195   :  { %8110 = vmatpush3.bf16.msra.mxu1 %v9186_v29 }
 0x196   :  { %8111 = vmatprep.subr.bf16.mxu1 %v9076_v1 }
 0x199   :  { %8113 = vmatpush3.bf16.msra.mxu1 %v9192_v34 }
 0x19a   :  { %8186 = vmatprep.subr.bf16.mxu1 %v9076_v1 }
 0x19c   :  { %6918 = vmatmul.mubr.f32.vlgmr.msra.gmra.mrb[0].mxu1 %v620_v22  ;;  %v1750_v22 = vand.u32 4294901760, %v9354_v59 }
 0x19d   :  { %7050 = vmatprep.mubr.msk.f32.mxu1 %vm9075_vm0, %v9074_v0  ;;  %8188 = vmatpush3.bf16.msra.mxu1 %v9350_v57 }
 0x19e   :  { %8189 = vmatprep.subr.bf16.mxu1 %v9076_v1  ;;  %v1751_v4 = vsub.f32 %v9354_v59, %v1750_v22  ;;  %v8235_v16 = vpack.c.bf16 %v1750_v22, %v1743_v21  ;;  %v6168_v59 = vld [vmem:[#allocation7 + $0x102] ss:$0 sm:$0xff] }
 0x1a0   :  { %v1752_v25 = vand.u32 4294901760, %v1751_v4 }
 0x1a1   :  { %8191 = vmatpush3.bf16.msra.mxu1 %v9363_v12 }
 0x1a2   :  { %8192 = vmatprep.subr.bf16.mxu1 %v9076_v1 }
 0x1a5   :  { %8194 = vmatpush3.bf16.msra.mxu1 %v9373_v19 }
 0x1a6   :  { %8195 = vmatprep.subr.bf16.mxu1 %v9076_v1 }
 0x1a9   :  { %8197 = vmatpush3.bf16.msra.mxu1 %v9377_v20 }
 0x1aa   :  { %8198 = vmatprep.subr.bf16.mxu1 %v9076_v1 }
 0x26f   :  { %v1080_v30 = vpop.f32.mrb[0].mxu1 }
 0x270   :  { %v9285_v31 = vsub.f32 %v9222_v17, %v1080_v30  ;;  %v6919_v32 = vpop.f32.mrb[1].mxu1  ;;  %v9368_v17 = vsub.f32 %v1647_v54, %v1676_v15  ;;  %v8199_v30 = vpack.c.bf16 %v1752_v25, %v1745_v8  ;;  %v8214_v54 = vpack.c.bf16 %v9358_v9, %v9356_v60 }
 0x271   :  { %v1758_v32 = vsub.f32 %v9356_v60, %v1757_v26 }
 0x272   :  { %v1085_v33 = vmul.f32 %v9285_v31, %v9285_v31  ;;  %v1785_v44 = vand.u32 4294901760, %v9368_v17  ;;  %v8220_v15 = vpack.c.bf16 %v9370_v18, %v9368_v17 }
 0x274   :  { %v1087_v35 = vsel %vm543_vm2, %v1085_v33, 0  ;;  %v1765_v33 = vsub.f32 %v9358_v9, %v1764_v10  ;;  %v1786_v48 = vsub.f32 %v9368_v17, %v1785_v44  ;;  %v8244_v8 = vpack.c.bf16 %v1792_v45, %v1785_v44 }
 0x275   :  { %v1162_v36 = vand.u32 4294901760, %v1087_v35 }
 0x276   :  { %v1787_v50 = vand.u32 4294901760, %v1786_v48 }
 0x277   :  { %v1163_v37 = vsub.f32 %v1087_v35, %v1162_v36  ;;  %v1759_v35 = vand.u32 4294901760, %v1758_v32 }
 0x278   :  { %v8208_v52 = vpack.c.bf16 %v1794_v51, %v1787_v50 }
 0x279   :  { %v1164_v38 = vand.u32 4294901760, %v1163_v37 }
 0x27b   :  { %v1165_v39 = vsub.f32 %v1163_v37, %v1164_v38 }
 0x27d   :  { %v1166_v40 = vand.u32 4294901760, %v1165_v39 }
 0x27f   :  { %6937 = vmatmul.mubr.f32.vlgmr.msra.gmra.mrb[2].mxu0 %v1166_v40 }
 0x280   :  { %8128 = vmatpush3.bf16.msra.mxu0 %v9226_v7  ;;  %6955 = vmatprep.mubr.msk.f32.mxu0 %vm9075_vm0, %v9074_v0 }
 0x281   :  { %8129 = vmatprep.subr.bf16.mxu0 %v9076_v1 }
 0x284   :  { %8131 = vmatpush3.bf16.msra.mxu0 %v9198_v47 }
 0x285   :  { %8132 = vmatprep.subr.bf16.mxu0 %v9076_v1 }
 0x288   :  { %8134 = vmatpush3.bf16.msra.mxu0 %v9200_v56 }
 0x289   :  { %8135 = vmatprep.subr.bf16.mxu0 %v9076_v1 }
 0x28c   :  { %8137 = vmatpush3.bf16.msra.mxu0 %v9202_v61 }
 0x28d   :  { %8138 = vmatprep.subr.bf16.mxu0 %v9076_v1 }
 0x28f   :  { %6956 = vmatmul.mubr.f32.vlgmr.msra.gmra.mrb[2].mxu0 %v1162_v36 }
 0x290   :  { %8140 = vmatpush3.bf16.msra.mxu0 %v9237_v27  ;;  %6974 = vmatprep.mubr.msk.f32.mxu0 %vm9075_vm0, %v9074_v0 }
 0x291   :  { %8141 = vmatprep.subr.bf16.mxu0 %v9076_v1 }
 0x294   :  { %8143 = vmatpush3.bf16.msra.mxu0 %v9204_v62 }
 0x295   :  { %8144 = vmatprep.subr.bf16.mxu0 %v9076_v1 }
 0x298   :  { %8146 = vmatpush3.bf16.msra.mxu0 %v9206_v63 }
 0x299   :  { %8147 = vmatprep.subr.bf16.mxu0 %v9076_v1 }
 0x29c   :  { %8149 = vmatpush3.bf16.msra.mxu0 %v9208_v2 }
 0x29d   :  { %8150 = vmatprep.subr.bf16.mxu0 %v9076_v1 }
 0x29f   :  { %6975 = vmatmul.mubr.f32.vlgmr.msra.gmra.mrb[2].mxu0 %v1163_v37  ;;  %v1771_v37 = vand.u32 4294901760, %v9360_v11 }
 0x2a0   :  { %8152 = vmatpush3.bf16.msra.mxu0 %v9157_v13  ;;  %6993 = vmatprep.mubr.msk.f32.mxu0 %vm9075_vm0, %v9074_v0 }
 0x2a1   :  { %8153 = vmatprep.subr.bf16.mxu0 %v9076_v1  ;;  %v1772_v40 = vsub.f32 %v9360_v11, %v1771_v37 }
 0x2a3   :  { %v1773_v42 = vand.u32 4294901760, %v1772_v40 }
 0x2a4   :  { %8155 = vmatpush3.bf16.msra.mxu0 %v9180_v24 }
 0x2a5   :  { %8156 = vmatprep.subr.bf16.mxu0 %v9076_v1 }
 0x2a8   :  { %8158 = vmatpush3.bf16.msra.mxu0 %v9186_v29 }
 0x2a9   :  { %8159 = vmatprep.subr.bf16.mxu0 %v9076_v1 }
 0x2ac   :  { %8161 = vmatpush3.bf16.msra.mxu0 %v9192_v34 }
 0x2ad   :  { %8162 = vmatprep.subr.bf16.mxu0 %v9076_v1 }
 0x2af   :  { %6994 = vmatmul.mubr.f32.vlgmr.msra.gmra.mrb[2].mxu0 %v1164_v38  ;;  %v1778_v38 = vand.u32 4294901760, %v9365_v14 }
 0x2b0   :  { %8164 = vmatpush3.bf16.msra.mxu0 %v9259_v28  ;;  %7012 = vmatprep.mubr.msk.f32.mxu0 %vm9075_vm0, %v9074_v0 }
 0x2b1   :  { %8165 = vmatprep.subr.bf16.mxu0 %v9076_v1  ;;  %v1779_v41 = vsub.f32 %v9365_v14, %v1778_v38  ;;  %v8241_v4 = vpack.c.bf16 %v1778_v38, %v1771_v37 }
 0x2b3   :  { %v1780_v43 = vand.u32 4294901760, %v1779_v41 }
 0x2b4   :  { %8167 = vmatpush3.bf16.msra.mxu0 %v9210_v3 }
 0x2b5   :  { %8168 = vmatprep.subr.bf16.mxu0 %v9076_v1  ;;  %v8205_v46 = vpack.c.bf16 %v1780_v43, %v1773_v42 }
 0x2b8   :  { %8170 = vmatpush3.bf16.msra.mxu0 %v9212_v5 }
 0x2b9   :  { %8171 = vmatprep.subr.bf16.mxu0 %v9076_v1 }
 0x2bc   :  { %8173 = vmatpush3.bf16.msra.mxu0 %v9214_v6 }
 0x2bd   :  { %8174 = vmatprep.subr.bf16.mxu0 %v9076_v1 }
 0x2bf   :  { %7013 = vmatmul.mubr.f32.vlgmr.msra.gmra.mrb[2].mxu0 %v1162_v36 }
 0x2c0   :  { %8176 = vmatpush3.bf16.msra.mxu0 %v9157_v13  ;;  %7031 = vmatprep.mubr.msk.f32.mxu0 %vm9075_vm0, %v9074_v0 }
 0x2c1   :  { %8177 = vmatprep.subr.bf16.mxu0 %v9076_v1 }
 0x2c4   :  { %8179 = vmatpush3.bf16.msra.mxu0 %v9180_v24 }
 0x2c5   :  { %8180 = vmatprep.subr.bf16.mxu0 %v9076_v1 }
 0x2c8   :  { %8182 = vmatpush3.bf16.msra.mxu0 %v9186_v29 }
 0x2c9   :  { %8183 = vmatprep.subr.bf16.mxu0 %v9076_v1 }
 0x2cc   :  { %8185 = vmatpush3.bf16.msra.mxu0 %v9192_v34 }
 0x2cd   :  { %8258 = vmatprep.subr.bf16.mxu0 %v9076_v1 }
 0x2cf   :  { %7032 = vmatmul.mubr.f32.vlgmr.msra.gmra.mrb[2].mxu0 %v1162_v36  ;;  %v1766_v36 = vand.u32 4294901760, %v1765_v33 }
 0x2d0   :  { %8260 = vmatpush3.bf16.msra.mxu0 %v9157_v13  ;;  %7164 = vmatprep.mubr.msk.f32.mxu0 %vm9075_vm0, %v9074_v0 }
 0x2d1   :  { %8261 = vmatprep.subr.bf16.mxu0 %v9076_v1  ;;  %v8202_v39 = vpack.c.bf16 %v1766_v36, %v1759_v35  ;;  %v6167_v36 = vld [vmem:[#allocation7 + $0x101] ss:$0 sm:$0xff] }
 0x2d4   :  { %8263 = vmatpush3.bf16.msra.mxu0 %v9180_v24 }
 0x2d5   :  { %8264 = vmatprep.subr.bf16.mxu0 %v9076_v1 }
 0x2d8   :  { %8266 = vmatpush3.bf16.msra.mxu0 %v9186_v29 }
 0x2d9   :  { %8267 = vmatprep.subr.bf16.mxu0 %v9076_v1 }
 0x2dc   :  { %8269 = vmatpush3.bf16.msra.mxu0 %v9192_v34 }
 0x2dd   :  { %8270 = vmatprep.subr.bf16.mxu0 %v9076_v1 }
 0x3a2   :  { %v1622_v25 = vpop.f32.mrb[2].mxu0 }
 0x3a3   :  { %v8835_v32 = vadd.f32 1e-05, %v1622_v25  ;;  %v7033_v33 = vpop.f32.mrb[3].mxu0 }
 0x3a5   :  { %8959 = vrsqrt.f32 %v8835_v32 }
 0x3af   :  { %v8960_v35 = vpop.eup %8959 }
 0x3b0   :  { %v1627_v58 = vmul.f32 %v8960_v35, %v9285_v31  ;;  %v6169_v31 = vld [vmem:[#allocation7 + $0x103] ss:$0 sm:$0xff] }
 0x3b2   :  { %v1633_v60 = vmul.f32 %v6167_v36, %v1627_v58 }
 0x3b4   :  { %v1639_v9 = vadd.f32 %v6168_v59, %v1633_v60 }
 0x3b6   :  { %8961 = vtanh.f32 %v1639_v9 }
 0x3c0   :  { %v8962_v11 = vpop.eup %8961 }
 0x3c1   :  { %v1655_v14 = vsel %vm543_vm2, %v8962_v11, 0 }
 0x3c2   :  { %v1730_v17 = vand.u32 4294901760, %v1655_v14 }
 0x3c4   :  { %v1731_v18 = vsub.f32 %v1655_v14, %v1730_v17 }
 0x3c6   :  { %v1732_v21 = vand.u32 4294901760, %v1731_v18 }
 0x3c8   :  { %v1733_v22 = vsub.f32 %v1731_v18, %v1732_v21 }
 0x3ca   :  { %v1734_v26 = vand.u32 4294901760, %v1733_v22 }
 0x3cc   :  { %7051 = vmatmul.mubr.f32.vlgmr.msra.gmra.mrb[2].mxu1 %v1734_v26 }
 0x3cd   :  { %8200 = vmatpush3.bf16.msra.mxu1 %v8199_v30  ;;  %7069 = vmatprep.mubr.msk.f32.mxu1 %vm9075_vm0, %v9074_v0 }
 0x3ce   :  { %8201 = vmatprep.subr.bf16.mxu1 %v9076_v1 }
 0x3d1   :  { %8203 = vmatpush3.bf16.msra.mxu1 %v8202_v39 }
 0x3d2   :  { %8204 = vmatprep.subr.bf16.mxu1 %v9076_v1 }
 0x3d5   :  { %8206 = vmatpush3.bf16.msra.mxu1 %v8205_v46 }
 0x3d6   :  { %8207 = vmatprep.subr.bf16.mxu1 %v9076_v1 }
 0x3d9   :  { %8209 = vmatpush3.bf16.msra.mxu1 %v8208_v52 }
 0x3da   :  { %8210 = vmatprep.subr.bf16.mxu1 %v9076_v1 }
 0x3dc   :  { %7070 = vmatmul.mubr.f32.vlgmr.msra.gmra.mrb[2].mxu1 %v1730_v17 }
 0x3dd   :  { %8212 = vmatpush3.bf16.msra.mxu1 %v8211_v53  ;;  %7088 = vmatprep.mubr.msk.f32.mxu1 %vm9075_vm0, %v9074_v0 }
 0x3de   :  { %8213 = vmatprep.subr.bf16.mxu1 %v9076_v1 }
 0x3e1   :  { %8215 = vmatpush3.bf16.msra.mxu1 %v8214_v54 }
 0x3e2   :  { %8216 = vmatprep.subr.bf16.mxu1 %v9076_v1 }
 0x3e5   :  { %8218 = vmatpush3.bf16.msra.mxu1 %v8217_v55 }
 0x3e6   :  { %8219 = vmatprep.subr.bf16.mxu1 %v9076_v1 }
 0x3e9   :  { %8221 = vmatpush3.bf16.msra.mxu1 %v8220_v15 }
 0x3ea   :  { %8222 = vmatprep.subr.bf16.mxu1 %v9076_v1 }
 0x3ec   :  { %7089 = vmatmul.mubr.f32.vlgmr.msra.gmra.mrb[2].mxu1 %v1731_v18 }
 0x3ed   :  { %8224 = vmatpush3.bf16.msra.mxu1 %v9350_v57  ;;  %7107 = vmatprep.mubr.msk.f32.mxu1 %vm9075_vm0, %v9074_v0 }
 0x3ee   :  { %8225 = vmatprep.subr.bf16.mxu1 %v9076_v1 }
 0x3f1   :  { %8227 = vmatpush3.bf16.msra.mxu1 %v9363_v12 }
 0x3f2   :  { %8228 = vmatprep.subr.bf16.mxu1 %v9076_v1 }
 0x3f5   :  { %8230 = vmatpush3.bf16.msra.mxu1 %v9373_v19 }
 0x3f6   :  { %8231 = vmatprep.subr.bf16.mxu1 %v9076_v1 }
 0x3f9   :  { %8233 = vmatpush3.bf16.msra.mxu1 %v9377_v20 }
 0x3fa   :  { %8234 = vmatprep.subr.bf16.mxu1 %v9076_v1 }
 0x3fc   :  { %7108 = vmatmul.mubr.f32.vlgmr.msra.gmra.mrb[2].mxu1 %v1732_v21 }
 0x3fd   :  { %8236 = vmatpush3.bf16.msra.mxu1 %v8235_v16  ;;  %7126 = vmatprep.mubr.msk.f32.mxu1 %vm9075_vm0, %v9074_v0 }
 0x3fe   :  { %8237 = vmatprep.subr.bf16.mxu1 %v9076_v1 }
 0x401   :  { %8239 = vmatpush3.bf16.msra.mxu1 %v8238_v23 }
 0x402   :  { %8240 = vmatprep.subr.bf16.mxu1 %v9076_v1 }
 0x405   :  { %8242 = vmatpush3.bf16.msra.mxu1 %v8241_v4 }
 0x406   :  { %8243 = vmatprep.subr.bf16.mxu1 %v9076_v1 }
 0x409   :  { %8245 = vmatpush3.bf16.msra.mxu1 %v8244_v8 }
 0x40a   :  { %8246 = vmatprep.subr.bf16.mxu1 %v9076_v1 }
 0x40c   :  { %7127 = vmatmul.mubr.f32.vlgmr.msra.gmra.mrb[2].mxu1 %v1730_v17 }
 0x40d   :  { %8248 = vmatpush3.bf16.msra.mxu1 %v9350_v57  ;;  %7145 = vmatprep.mubr.msk.f32.mxu1 %vm9075_vm0, %v9074_v0 }
 0x40e   :  { %8249 = vmatprep.subr.bf16.mxu1 %v9076_v1 }
 0x411   :  { %8251 = vmatpush3.bf16.msra.mxu1 %v9363_v12 }
 0x412   :  { %8252 = vmatprep.subr.bf16.mxu1 %v9076_v1 }
 0x415   :  { %8254 = vmatpush3.bf16.msra.mxu1 %v9373_v19 }
 0x416   :  { %8255 = vmatprep.subr.bf16.mxu1 %v9076_v1 }
 0x419   :  { %8257 = vmatpush3.bf16.msra.mxu1 %v9377_v20 }
 0x41a   :  { %8330 = vmatprep.subr.bf16.mxu1 %v9076_v1 }
 0x41c   :  { %7146 = vmatmul.mubr.f32.vlgmr.msra.gmra.mrb[2].mxu1 %v1730_v17 }
 0x41d   :  { %8332 = vmatpush3.bf16.msra.mxu1 %v9157_v13  ;;  %7278 = vmatprep.mubr.msk.f32.mxu1 %vm9075_vm0, %v9074_v0 }
 0x41e   :  { %8333 = vmatprep.subr.bf16.mxu1 %v9076_v1 }
 0x421   :  { %8335 = vmatpush3.bf16.msra.mxu1 %v9180_v24 }
 0x422   :  { %8336 = vmatprep.subr.bf16.mxu1 %v9076_v1 }
 0x425   :  { %8338 = vmatpush3.bf16.msra.mxu1 %v9186_v29 }
 0x426   :  { %8339 = vmatprep.subr.bf16.mxu1 %v9076_v1 }
 0x429   :  { %8341 = vmatpush3.bf16.msra.mxu1 %v9192_v34 }
 0x42a   :  { %8342 = vmatprep.subr.bf16.mxu1 %v9076_v1 }
 0x4ef   :  { %v2190_v57 = vpop.f32.mrb[2].mxu1 }
 0x4f0   :  { %v8836_v12 = vadd.f32 %v6169_v31, %v2190_v57  ;;  %v7147_v19 = vpop.f32.mrb[3].mxu1 }
 0x4f2   :  { %v2195_v20 = vsel %vm543_vm2, %v8836_v12, 0 }
 0x4f3   :  { %v2270_v10 = vand.u32 4294901760, %v2195_v20 }
 0x4f5   :  { %v2271_v30 = vsub.f32 %v2195_v20, %v2270_v10 }
 0x4f7   :  { %v2272_v37 = vand.u32 4294901760, %v2271_v30 }
 0x4f9   :  { %v2273_v38 = vsub.f32 %v2271_v30, %v2272_v37 }
 0x4fb   :  { %v2274_v39 = vand.u32 4294901760, %v2273_v38 }
 0x4fd   :  { %7165 = vmatmul.mubr.f32.vlgmr.msra.gmra.mrb[4].mxu0 %v2274_v39 }
 0x4fe   :  { %8272 = vmatpush3.bf16.msra.mxu0 %v9226_v7  ;;  %7183 = vmatprep.mubr.msk.f32.mxu0 %vm9075_vm0, %v9074_v0 }
 0x4ff   :  { %8273 = vmatprep.subr.bf16.mxu0 %v9076_v1 }
 0x502   :  { %8275 = vmatpush3.bf16.msra.mxu0 %v9198_v47 }
 0x503   :  { %8276 = vmatprep.subr.bf16.mxu0 %v9076_v1 }
 0x506   :  { %8278 = vmatpush3.bf16.msra.mxu0 %v9200_v56 }
 0x507   :  { %8279 = vmatprep.subr.bf16.mxu0 %v9076_v1 }
 0x50a   :  { %8281 = vmatpush3.bf16.msra.mxu0 %v9202_v61 }
 0x50b   :  { %8282 = vmatprep.subr.bf16.mxu0 %v9076_v1 }
 0x50d   :  { %7184 = vmatmul.mubr.f32.vlgmr.msra.gmra.mrb[4].mxu0 %v2270_v10 }
 0x50e   :  { %8284 = vmatpush3.bf16.msra.mxu0 %v9237_v27  ;;  %7202 = vmatprep.mubr.msk.f32.mxu0 %vm9075_vm0, %v9074_v0 }
 0x50f   :  { %8285 = vmatprep.subr.bf16.mxu0 %v9076_v1 }
 0x512   :  { %8287 = vmatpush3.bf16.msra.mxu0 %v9204_v62 }
 0x513   :  { %8288 = vmatprep.subr.bf16.mxu0 %v9076_v1 }
 0x516   :  { %8290 = vmatpush3.bf16.msra.mxu0 %v9206_v63 }
 0x517   :  { %8291 = vmatprep.subr.bf16.mxu0 %v9076_v1 }
 0x51a   :  { %8293 = vmatpush3.bf16.msra.mxu0 %v9208_v2 }
 0x51b   :  { %8294 = vmatprep.subr.bf16.mxu0 %v9076_v1 }
 0x51d   :  { %7203 = vmatmul.mubr.f32.vlgmr.msra.gmra.mrb[4].mxu0 %v2271_v30 }
 0x51e   :  { %8296 = vmatpush3.bf16.msra.mxu0 %v9157_v13  ;;  %7221 = vmatprep.mubr.msk.f32.mxu0 %vm9075_vm0, %v9074_v0 }
 0x51f   :  { %8297 = vmatprep.subr.bf16.mxu0 %v9076_v1 }
 0x522   :  { %8299 = vmatpush3.bf16.msra.mxu0 %v9180_v24 }
 0x523   :  { %8300 = vmatprep.subr.bf16.mxu0 %v9076_v1 }
 0x526   :  { %8302 = vmatpush3.bf16.msra.mxu0 %v9186_v29 }
 0x527   :  { %8303 = vmatprep.subr.bf16.mxu0 %v9076_v1 }
 0x52a   :  { %8305 = vmatpush3.bf16.msra.mxu0 %v9192_v34 }
 0x52b   :  { %8306 = vmatprep.subr.bf16.mxu0 %v9076_v1 }
 0x52d   :  { %7222 = vmatmul.mubr.f32.vlgmr.msra.gmra.mrb[4].mxu0 %v2272_v37 }
 0x52e   :  { %8308 = vmatpush3.bf16.msra.mxu0 %v9259_v28  ;;  %7240 = vmatprep.mubr.msk.f32.mxu0 %vm9075_vm0, %v9074_v0 }
 0x52f   :  { %8309 = vmatprep.subr.bf16.mxu0 %v9076_v1 }
 0x532   :  { %8311 = vmatpush3.bf16.msra.mxu0 %v9210_v3 }
 0x533   :  { %8312 = vmatprep.subr.bf16.mxu0 %v9076_v1 }
 0x536   :  { %8314 = vmatpush3.bf16.msra.mxu0 %v9212_v5 }
 0x537   :  { %8315 = vmatprep.subr.bf16.mxu0 %v9076_v1 }
 0x53a   :  { %8317 = vmatpush3.bf16.msra.mxu0 %v9214_v6 }
 0x53b   :  { %8318 = vmatprep.subr.bf16.mxu0 %v9076_v1 }
 0x53d   :  { %7241 = vmatmul.mubr.f32.vlgmr.msra.gmra.mrb[4].mxu0 %v2270_v10 }
 0x53e   :  { %8320 = vmatpush3.bf16.msra.mxu0 %v9157_v13  ;;  %7259 = vmatprep.mubr.msk.f32.mxu0 %vm9075_vm0, %v9074_v0 }
 0x53f   :  { %8321 = vmatprep.subr.bf16.mxu0 %v9076_v1 }
 0x542   :  { %8323 = vmatpush3.bf16.msra.mxu0 %v9180_v24 }
 0x543   :  { %8324 = vmatprep.subr.bf16.mxu0 %v9076_v1 }
 0x546   :  { %8326 = vmatpush3.bf16.msra.mxu0 %v9186_v29 }
 0x547   :  { %8327 = vmatprep.subr.bf16.mxu0 %v9076_v1 }
 0x54a   :  { %8329 = vmatpush3.bf16.msra.mxu0 %v9192_v34 }
 0x54b   :  { %8402 = vmatprep.subr.bf16.mxu0 %v9076_v1 }
 0x54d   :  { %7260 = vmatmul.mubr.f32.vlgmr.msra.gmra.mrb[4].mxu0 %v2270_v10 }
 0x54e   :  { %7392 = vmatprep.mubr.msk.f32.mxu0 %vm9075_vm0, %v9074_v0 }
 0x620   :  { %v2730_v40 = vpop.f32.mrb[4].mxu0 }
 0x621   :  { %v9509_v41 = vsub.f32 %v8836_v12, %v2730_v40  ;;  %v7261_v42 = vpop.f32.mrb[5].mxu0 }
 0x623   :  { %v2735_v43 = vmul.f32 %v9509_v41, %v9509_v41 }
 0x625   :  { %v2737_v44 = vsel %vm543_vm2, %v2735_v43, 0 }
 0x626   :  { %v2812_v45 = vand.u32 4294901760, %v2737_v44 }
 0x628   :  { %v2813_v46 = vsub.f32 %v2737_v44, %v2812_v45 }
 0x62a   :  { %v2814_v48 = vand.u32 4294901760, %v2813_v46 }
 0x62c   :  { %v2815_v49 = vsub.f32 %v2813_v46, %v2814_v48 }
 0x62e   :  { %v2816_v50 = vand.u32 4294901760, %v2815_v49 }
 0x630   :  { %7279 = vmatmul.mubr.f32.vlgmr.msra.gmra.mrb[4].mxu1 %v2816_v50 }
 0x631   :  { %8344 = vmatpush3.bf16.msra.mxu1 %v9226_v7  ;;  %7297 = vmatprep.mubr.msk.f32.mxu1 %vm9075_vm0, %v9074_v0  ;;  %v3297_v7 = vld [vmem:[#allocation5 + $0x78] sm:$0xff] }
 0x632   :  { %8345 = vmatprep.subr.bf16.mxu1 %v9076_v1  ;;  %v3326_v16 = vand.u32 4294901760, %v3297_v7 }
 0x634   :  { %v9584_v4 = vsub.f32 %v3297_v7, %v3326_v16  ;;  %v6170_v7 = vld [vmem:[#allocation7 + $0x104] ss:$0 sm:$0xff] }
 0x635   :  { %8347 = vmatpush3.bf16.msra.mxu1 %v9198_v47  ;;  %v3292_v47 = vld [vmem:[#allocation5 + $0x50] sm:$0xff] }
 0x636   :  { %8348 = vmatprep.subr.bf16.mxu1 %v9076_v1  ;;  %v3435_v30 = vand.u32 4294901760, %v9584_v4 }
 0x638   :  { %v3436_v39 = vsub.f32 %v9584_v4, %v3435_v30 }
 0x639   :  { %8350 = vmatpush3.bf16.msra.mxu1 %v9200_v56  ;;  %v3293_v56 = vld [vmem:[#allocation5 + $0x58] sm:$0xff] }
 0x63a   :  { %8351 = vmatprep.subr.bf16.mxu1 %v9076_v1  ;;  %v3437_v42 = vand.u32 4294901760, %v3436_v39 }
 0x63d   :  { %8353 = vmatpush3.bf16.msra.mxu1 %v9202_v61 }
 0x63e   :  { %8354 = vmatprep.subr.bf16.mxu1 %v9076_v1 }
 0x640   :  { %7298 = vmatmul.mubr.f32.vlgmr.msra.gmra.mrb[4].mxu1 %v2812_v45 }
 0x641   :  { %8356 = vmatpush3.bf16.msra.mxu1 %v9237_v27  ;;  %7316 = vmatprep.mubr.msk.f32.mxu1 %vm9075_vm0, %v9074_v0 }
 0x642   :  { %8357 = vmatprep.subr.bf16.mxu1 %v9076_v1 }
 0x645   :  { %8359 = vmatpush3.bf16.msra.mxu1 %v9204_v62  ;;  %v3311_v62 = vand.u32 4294901760, %v3292_v47 }
 0x646   :  { %8360 = vmatprep.subr.bf16.mxu1 %v9076_v1 }
 0x647   :  { %v9570_v51 = vsub.f32 %v3292_v47, %v3311_v62 }
 0x649   :  { %8362 = vmatpush3.bf16.msra.mxu1 %v9206_v63  ;;  %v3314_v63 = vand.u32 4294901760, %v3293_v56  ;;  %v3400_v35 = vand.u32 4294901760, %v9570_v51 }
 0x64a   :  { %8363 = vmatprep.subr.bf16.mxu1 %v9076_v1 }
 0x64b   :  { %v9572_v52 = vsub.f32 %v3293_v56, %v3314_v63  ;;  %v3401_v58 = vsub.f32 %v9570_v51, %v3400_v35 }
 0x64d   :  { %8365 = vmatpush3.bf16.msra.mxu1 %v9208_v2  ;;  %v3295_v2 = vld [vmem:[#allocation5 + $0x68] sm:$0xff]  ;;  %v3402_v60 = vand.u32 4294901760, %v3401_v58  ;;  %v3407_v9 = vand.u32 4294901760, %v9572_v52 }
 0x64e   :  { %8366 = vmatprep.subr.bf16.mxu1 %v9076_v1 }
 0x64f   :  { %v3408_v17 = vsub.f32 %v9572_v52, %v3407_v9 }
 0x650   :  { %7317 = vmatmul.mubr.f32.vlgmr.msra.gmra.mrb[4].mxu1 %v2813_v46 }
 0x651   :  { %8368 = vmatpush3.bf16.msra.mxu1 %v9157_v13  ;;  %7335 = vmatprep.mubr.msk.f32.mxu1 %vm9075_vm0, %v9074_v0  ;;  %v3409_v21 = vand.u32 4294901760, %v3408_v17 }
 0x652   :  { %8369 = vmatprep.subr.bf16.mxu1 %v9076_v1 }
 0x655   :  { %8371 = vmatpush3.bf16.msra.mxu1 %v9180_v24 }
 0x656   :  { %8372 = vmatprep.subr.bf16.mxu1 %v9076_v1 }
 0x659   :  { %8374 = vmatpush3.bf16.msra.mxu1 %v9186_v29 }
 0x65a   :  { %8375 = vmatprep.subr.bf16.mxu1 %v9076_v1 }
 0x65d   :  { %8377 = vmatpush3.bf16.msra.mxu1 %v9192_v34 }
 0x65e   :  { %8378 = vmatprep.subr.bf16.mxu1 %v9076_v1 }
 0x660   :  { %7336 = vmatmul.mubr.f32.vlgmr.msra.gmra.mrb[4].mxu1 %v2814_v48 }
 0x661   :  { %8380 = vmatpush3.bf16.msra.mxu1 %v9259_v28  ;;  %7354 = vmatprep.mubr.msk.f32.mxu1 %vm9075_vm0, %v9074_v0 }
 0x662   :  { %8381 = vmatprep.subr.bf16.mxu1 %v9076_v1 }
 0x665   :  { %8383 = vmatpush3.bf16.msra.mxu1 %v9210_v3  ;;  %v3296_v3 = vld [vmem:[#allocation5 + $0x70] sm:$0xff] }
 0x666   :  { %8384 = vmatprep.subr.bf16.mxu1 %v9076_v1 }
 0x669   :  { %8386 = vmatpush3.bf16.msra.mxu1 %v9212_v5  ;;  %v3320_v5 = vand.u32 4294901760, %v3295_v2 }
 0x66a   :  { %8387 = vmatprep.subr.bf16.mxu1 %v9076_v1 }
 0x66b   :  { %v9576_v54 = vsub.f32 %v3295_v2, %v3320_v5 }
 0x66d   :  { %8389 = vmatpush3.bf16.msra.mxu1 %v9214_v6  ;;  %v3323_v6 = vand.u32 4294901760, %v3296_v3  ;;  %v3421_v26 = vand.u32 4294901760, %v9576_v54 }
 0x66e   :  { %8390 = vmatprep.subr.bf16.mxu1 %v9076_v1 }
 0x66f   :  { %v9581_v15 = vsub.f32 %v3296_v3, %v3323_v6  ;;  %v9589_v25 = vpack.c.bf16 %v3323_v6, %v3320_v5  ;;  %v3422_v12 = vsub.f32 %v9576_v54, %v3421_v26 }
 0x670   :  { %7355 = vmatmul.mubr.f32.vlgmr.msra.gmra.mrb[4].mxu1 %v2812_v45 }
 0x671   :  { %8392 = vmatpush3.bf16.msra.mxu1 %v9157_v13  ;;  %7373 = vmatprep.mubr.msk.f32.mxu1 %vm9075_vm0, %v9074_v0  ;;  %v3291_v13 = vld [vmem:[#allocation5 + $0x48] sm:$0xff]  ;;  %v3428_v31 = vand.u32 4294901760, %v9581_v15  ;;  %v3423_v20 = vand.u32 4294901760, %v3422_v12  ;;  %v8433_v48 = vpack.c.bf16 %v9581_v15, %v9576_v54 }
 0x672   :  { %8393 = vmatprep.subr.bf16.mxu1 %v9076_v1  ;;  %v3308_v61 = vand.u32 4294901760, %v3291_v13 }
 0x673   :  { %v3429_v19 = vsub.f32 %v9581_v15, %v3428_v31  ;;  %v8457_v47 = vpack.c.bf16 %v3428_v31, %v3421_v26 }
 0x674   :  { %v9566_v27 = vpack.c.bf16 %v3311_v62, %v3308_v61  ;;  %v9568_v28 = vsub.f32 %v3291_v13, %v3308_v61  ;;  %v9624_v61 = vld [vmem:[#allocation7 + $0x40] sm:$0xff]  ;;  %v9626_v62 = vld [vmem:[#allocation7 + $0x48] sm:$0xff] }
 0x675   :  { %8395 = vmatpush3.bf16.msra.mxu1 %v9180_v24  ;;  %v3294_v24 = vld [vmem:[#allocation5 + $0x60] sm:$0xff]  ;;  %v3430_v10 = vand.u32 4294901760, %v3429_v19 }
 0x676   :  { %8396 = vmatprep.subr.bf16.mxu1 %v9076_v1  ;;  %8404 = vmatpush3.bf16.msra.mxu0 %v9566_v27  ;;  %v3393_v33 = vand.u32 4294901760, %v9568_v28 }
 0x677   :  { %8405 = vmatprep.subr.bf16.mxu0 %v9076_v1  ;;  %v8421_v38 = vpack.c.bf16 %v3430_v10, %v3423_v20 }
 0x678   :  { %v3394_v36 = vsub.f32 %v9568_v28, %v3393_v33  ;;  %v8451_v50 = vpack.c.bf16 %v3400_v35, %v3393_v33 }
 0x679   :  { %8398 = vmatpush3.bf16.msra.mxu1 %v9186_v29  ;;  %v3317_v29 = vand.u32 4294901760, %v3294_v24 }
 0x67a   :  { %8399 = vmatprep.subr.bf16.mxu1 %v9076_v1  ;;  %v3395_v59 = vand.u32 4294901760, %v3394_v36  ;;  %v68_v36 = vld [vmem:[#allocation7 + $0x68] sm:$0xff] }
 0x67b   :  { %v9574_v53 = vsub.f32 %v3294_v24, %v3317_v29  ;;  %v9579_v55 = vpack.c.bf16 %v3317_v29, %v3314_v63  ;;  %v3848_v24 = vand.u32 4294901760, %v9624_v61  ;;  %v3851_v63 = vand.u32 4294901760, %v9626_v62 }
 0x67c   :  { %v8415_v14 = vpack.c.bf16 %v3402_v60, %v3395_v59  ;;  %v3863_v58 = vand.u32 4294901760, %v68_v36  ;;  %v69_v60 = vld [vmem:[#allocation7 + $0x70] sm:$0xff] }
 0x67d   :  { %8401 = vmatpush3.bf16.msra.mxu1 %v9192_v34  ;;  %v3298_v34 = vld [vmem:[#allocation5 + $0x80] sm:$0xff]  ;;  %8407 = vmatpush3.bf16.msra.mxu0 %v9579_v55  ;;  %v3414_v11 = vand.u32 4294901760, %v9574_v53  ;;  %v8430_v46 = vpack.c.bf16 %v9574_v53, %v9572_v52  ;;  %v9634_v2 = vpack.c.bf16 %v3851_v63, %v3848_v24 }
 0x67e   :  { %8474 = vmatprep.subr.bf16.mxu1 %v9076_v1  ;;  %v3329_v23 = vand.u32 4294901760, %v3298_v34  ;;  %8408 = vmatprep.subr.bf16.mxu0 %v9076_v1  ;;  %v3967_v19 = vsub.f32 %v68_v36, %v3863_v58 }
 0x67f   :  { %v3415_v18 = vsub.f32 %v9574_v53, %v3414_v11  ;;  %v8454_v13 = vpack.c.bf16 %v3414_v11, %v3407_v9  ;;  %v70_v9 = vld [vmem:[#allocation7 + $0x78] sm:$0xff]  ;;  %v3866_v11 = vand.u32 4294901760, %v69_v60 }
 0x680   :  { %7374 = vmatmul.mubr.f32.vlgmr.msra.gmra.mrb[4].mxu1 %v2812_v45  ;;  %v9586_v8 = vsub.f32 %v3298_v34, %v3329_v23  ;;  %v9593_v32 = vpack.c.bf16 %v3329_v23, %v3326_v16  ;;  %v8427_v45 = vpack.c.bf16 %v9570_v51, %v9568_v28  ;;  %v6171_v28 = vld [vmem:[#allocation7 + $0x105] ss:$0 sm:$0xff] }
 0x681   :  { %7506 = vmatprep.mubr.msk.f32.mxu1 %vm9075_vm0, %v9074_v0  ;;  %8410 = vmatpush3.bf16.msra.mxu0 %v9589_v25  ;;  %v3416_v22 = vand.u32 4294901760, %v3415_v18 }
 0x682   :  { %8411 = vmatprep.subr.bf16.mxu0 %v9076_v1  ;;  %v3442_v37 = vand.u32 4294901760, %v9586_v8  ;;  %v8436_v49 = vpack.c.bf16 %v9586_v8, %v9584_v4  ;;  %8476 = vmatpush3.bf16.msra.mxu1 %v9634_v2 }
 0x683   :  { %v8418_v57 = vpack.c.bf16 %v3416_v22, %v3409_v21  ;;  %8477 = vmatprep.subr.bf16.mxu1 %v9076_v1 }
 0x684   :  { %v3443_v40 = vsub.f32 %v9586_v8, %v3442_v37  ;;  %v9622_v56 = vpack.c.bf16 %v3442_v37, %v3435_v30  ;;  %v3968_v37 = vand.u32 4294901760, %v3967_v19 }
 0x685   :  { %8413 = vmatpush3.bf16.msra.mxu0 %v9593_v32 }
 0x686   :  { %8414 = vmatprep.subr.bf16.mxu0 %v9076_v1  ;;  %v3444_v43 = vand.u32 4294901760, %v3443_v40  ;;  %v3969_v40 = vsub.f32 %v3967_v19, %v3968_v37 }
 0x688   :  { %v8424_v44 = vpack.c.bf16 %v3444_v43, %v3437_v42  ;;  %v3974_v42 = vsub.f32 %v69_v60, %v3866_v11 }
 0x753   :  { %v3272_v3 = vpop.f32.mrb[4].mxu1 }
 0x754   :  { %v8837_v29 = vadd.f32 1e-05, %v3272_v3  ;;  %v7375_v5 = vpop.f32.mrb[5].mxu1 }
 0x756   :  { %8963 = vrsqrt.f32 %v8837_v29 }
 0x760   :  { %v8964_v6 = vpop.eup %8963 }
 0x761   :  { %v3277_v34 = vmul.f32 %v8964_v6, %v9509_v41  ;;  %v65_v41 = vld [vmem:[#allocation7 + $0x50] sm:$0xff] }
 0x763   :  { %v3283_v51 = vmul.f32 %v6170_v7, %v3277_v34 }
 0x765   :  { %v3289_v52 = vadd.f32 %v6171_v28, %v3283_v51  ;;  %v3932_v51 = vsub.f32 %v9624_v61, %v3848_v24 }
 0x767   :  { %8965 = vtanh.f32 %v3289_v52  ;;  %v3939_v52 = vsub.f32 %v9626_v62, %v3851_v63 }
 0x769   :  { %v9740_v63 = vpack.c.bf16 %v3939_v52, %v3932_v51 }
 0x771   :  { %v8966_v53 = vpop.eup %8965 }
 0x772   :  { %v3305_v54 = vsel %vm543_vm2, %v8966_v53, 0  ;;  %v6172_v53 = vld [vmem:[#allocation7 + $0x106] ss:$0 sm:$0xff] }
 0x773   :  { %v3380_v15 = vand.u32 4294901760, %v3305_v54 }
 0x775   :  { %v3381_v16 = vsub.f32 %v3305_v54, %v3380_v15  ;;  %v3933_v54 = vand.u32 4294901760, %v3932_v51 }
 0x777   :  { %v3382_v23 = vand.u32 4294901760, %v3381_v16 }
 0x779   :  { %v3383_v4 = vsub.f32 %v3381_v16, %v3382_v23 }
 0x77b   :  { %v3384_v8 = vand.u32 4294901760, %v3383_v4 }
 0x77d   :  { %7393 = vmatmul.mubr.f32.vlgmr.msra.gmra.mrb[6].mxu0 %v3384_v8 }
 0x77e   :  { %8416 = vmatpush3.bf16.msra.mxu0 %v8415_v14  ;;  %7411 = vmatprep.mubr.msk.f32.mxu0 %vm9075_vm0, %v9074_v0  ;;  %v3869_v14 = vand.u32 4294901760, %v70_v9 }
 0x77f   :  { %8417 = vmatprep.subr.bf16.mxu0 %v9076_v1 }
 0x780   :  { %v9695_v17 = vpack.c.bf16 %v3869_v14, %v3866_v11  ;;  %v3981_v43 = vsub.f32 %v70_v9, %v3869_v14 }
 0x782   :  { %8419 = vmatpush3.bf16.msra.mxu0 %v8418_v57  ;;  %v9711_v6 = vpack.c.bf16 %v3981_v43, %v3974_v42 }
 0x783   :  { %8420 = vmatprep.subr.bf16.mxu0 %v9076_v1 }
 0x786   :  { %8422 = vmatpush3.bf16.msra.mxu0 %v8421_v38 }
 0x787   :  { %8423 = vmatprep.subr.bf16.mxu0 %v9076_v1 }
 0x78a   :  { %8425 = vmatpush3.bf16.msra.mxu0 %v8424_v44 }
 0x78b   :  { %8426 = vmatprep.subr.bf16.mxu0 %v9076_v1 }
 0x78d   :  { %7412 = vmatmul.mubr.f32.vlgmr.msra.gmra.mrb[6].mxu0 %v3380_v15 }
 0x78e   :  { %8428 = vmatpush3.bf16.msra.mxu0 %v8427_v45  ;;  %7430 = vmatprep.mubr.msk.f32.mxu0 %vm9075_vm0, %v9074_v0  ;;  %v3970_v45 = vand.u32 4294901760, %v3969_v40 }
 0x78f   :  { %8429 = vmatprep.subr.bf16.mxu0 %v9076_v1 }
 0x792   :  { %8431 = vmatpush3.bf16.msra.mxu0 %v8430_v46  ;;  %v3975_v46 = vand.u32 4294901760, %v3974_v42 }
 0x793   :  { %8432 = vmatprep.subr.bf16.mxu0 %v9076_v1 }
 0x796   :  { %8434 = vmatpush3.bf16.msra.mxu0 %v8433_v48  ;;  %v3982_v48 = vand.u32 4294901760, %v3981_v43 }
 0x797   :  { %8435 = vmatprep.subr.bf16.mxu0 %v9076_v1 }
 0x798   :  { %v9717_v28 = vpack.c.bf16 %v3982_v48, %v3975_v46 }
 0x79a   :  { %8437 = vmatpush3.bf16.msra.mxu0 %v8436_v49 }
 0x79b   :  { %8438 = vmatprep.subr.bf16.mxu0 %v9076_v1 }
 0x79d   :  { %7431 = vmatmul.mubr.f32.vlgmr.msra.gmra.mrb[6].mxu0 %v3381_v16 }
 0x79e   :  { %8440 = vmatpush3.bf16.msra.mxu0 %v9566_v27  ;;  %7449 = vmatprep.mubr.msk.f32.mxu0 %vm9075_vm0, %v9074_v0 }
 0x79f   :  { %8441 = vmatprep.subr.bf16.mxu0 %v9076_v1 }
 0x7a2   :  { %8443 = vmatpush3.bf16.msra.mxu0 %v9579_v55 }
 0x7a3   :  { %8444 = vmatprep.subr.bf16.mxu0 %v9076_v1 }
 0x7a6   :  { %8446 = vmatpush3.bf16.msra.mxu0 %v9589_v25 }
 0x7a7   :  { %8447 = vmatprep.subr.bf16.mxu0 %v9076_v1 }
 0x7aa   :  { %8449 = vmatpush3.bf16.msra.mxu0 %v9593_v32 }
 0x7ab   :  { %8450 = vmatprep.subr.bf16.mxu0 %v9076_v1 }
 0x7ad   :  { %7450 = vmatmul.mubr.f32.vlgmr.msra.gmra.mrb[6].mxu0 %v3382_v23 }
 0x7ae   :  { %8452 = vmatpush3.bf16.msra.mxu0 %v8451_v50  ;;  %7468 = vmatprep.mubr.msk.f32.mxu0 %vm9075_vm0, %v9074_v0  ;;  %v3976_v50 = vsub.f32 %v3974_v42, %v3975_v46  ;;  %v4947_v42 = vld [vmem:[#allocation5 + $0xb8] sm:$0xff] }
 0x7af   :  { %8453 = vmatprep.subr.bf16.mxu0 %v9076_v1 }
 0x7b2   :  { %8455 = vmatpush3.bf16.msra.mxu0 %v8454_v13  ;;  %v3983_v13 = vsub.f32 %v3981_v43, %v3982_v48 }
 0x7b3   :  { %8456 = vmatprep.subr.bf16.mxu0 %v9076_v1 }
 0x7b6   :  { %8458 = vmatpush3.bf16.msra.mxu0 %v8457_v47  ;;  %v3977_v47 = vand.u32 4294901760, %v3976_v50 }
 0x7b7   :  { %8459 = vmatprep.subr.bf16.mxu0 %v9076_v1 }
 0x7ba   :  { %8461 = vmatpush3.bf16.msra.mxu0 %v9622_v56  ;;  %v3984_v56 = vand.u32 4294901760, %v3983_v13 }
 0x7bb   :  { %8462 = vmatprep.subr.bf16.mxu0 %v9076_v1 }
 0x7bc   :  { %v9705_v3 = vpack.c.bf16 %v3984_v56, %v3977_v47  ;;  %v4976_v47 = vand.u32 4294901760, %v4947_v42 }
 0x7bd   :  { %7469 = vmatmul.mubr.f32.vlgmr.msra.gmra.mrb[6].mxu0 %v3380_v15 }
 0x7be   :  { %8464 = vmatpush3.bf16.msra.mxu0 %v9566_v27  ;;  %7487 = vmatprep.mubr.msk.f32.mxu0 %vm9075_vm0, %v9074_v0  ;;  %v66_v27 = vld [vmem:[#allocation7 + $0x58] sm:$0xff] }
 0x7bf   :  { %8465 = vmatprep.subr.bf16.mxu0 %v9076_v1  ;;  %v3857_v33 = vand.u32 4294901760, %v66_v27 }
 0x7c1   :  { %v3953_v21 = vsub.f32 %v66_v27, %v3857_v33 }
 0x7c2   :  { %8467 = vmatpush3.bf16.msra.mxu0 %v9579_v55  ;;  %v3854_v55 = vand.u32 4294901760, %v65_v41 }
 0x7c3   :  { %8468 = vmatprep.subr.bf16.mxu0 %v9076_v1  ;;  %v3954_v26 = vand.u32 4294901760, %v3953_v21 }
 0x7c4   :  { %v9683_v35 = vpack.c.bf16 %v3857_v33, %v3854_v55  ;;  %v3946_v18 = vsub.f32 %v65_v41, %v3854_v55  ;;  %v3934_v41 = vsub.f32 %v3932_v51, %v3933_v54 }
 0x7c5   :  { %v3955_v57 = vsub.f32 %v3953_v21, %v3954_v26 }
 0x7c6   :  { %8470 = vmatpush3.bf16.msra.mxu0 %v9589_v25  ;;  %v67_v25 = vld [vmem:[#allocation7 + $0x60] sm:$0xff]  ;;  %8479 = vmatpush3.bf16.msra.mxu1 %v9683_v35  ;;  %v3947_v22 = vand.u32 4294901760, %v3946_v18  ;;  %v9707_v29 = vpack.c.bf16 %v3953_v21, %v3946_v18 }
 0x7c7   :  { %8471 = vmatprep.subr.bf16.mxu0 %v9076_v1  ;;  %8480 = vmatprep.subr.bf16.mxu1 %v9076_v1  ;;  %v3956_v10 = vand.u32 4294901760, %v3955_v57 }
 0x7c8   :  { %v3948_v31 = vsub.f32 %v3946_v18, %v3947_v22  ;;  %v9713_v7 = vpack.c.bf16 %v3954_v26, %v3947_v22 }
 0x7ca   :  { %8473 = vmatpush3.bf16.msra.mxu0 %v9593_v32  ;;  %v3860_v32 = vand.u32 4294901760, %v67_v25  ;;  %v3949_v20 = vand.u32 4294901760, %v3948_v31 }
 0x7cb   :  { %8546 = vmatprep.subr.bf16.mxu0 %v9076_v1 }
 0x7cc   :  { %v9689_v59 = vpack.c.bf16 %v3863_v58, %v3860_v32  ;;  %v3960_v12 = vsub.f32 %v67_v25, %v3860_v32  ;;  %v9701_v38 = vpack.c.bf16 %v3956_v10, %v3949_v20  ;;  %v3935_v25 = vand.u32 4294901760, %v3934_v41 }
 0x7cd   :  { %7488 = vmatmul.mubr.f32.vlgmr.msra.gmra.mrb[6].mxu0 %v3380_v15  ;;  %v3940_v15 = vand.u32 4294901760, %v3939_v52 }
 0x7ce   :  { %8548 = vmatpush3.bf16.msra.mxu0 %v9634_v2  ;;  %7620 = vmatprep.mubr.msk.f32.mxu0 %vm9075_vm0, %v9074_v0  ;;  %v3961_v30 = vand.u32 4294901760, %v3960_v12  ;;  %v9709_v5 = vpack.c.bf16 %v3967_v19, %v3960_v12  ;;  %v4943_v19 = vld [vmem:[#allocation5 + $0x98] sm:$0xff] }
 0x7cf   :  { %8549 = vmatprep.subr.bf16.mxu0 %v9076_v1  ;;  %8482 = vmatpush3.bf16.msra.mxu1 %v9689_v59  ;;  %v3941_v27 = vsub.f32 %v3939_v52, %v3940_v15  ;;  %v9762_v58 = vpack.c.bf16 %v3940_v15, %v3933_v54 }
 0x7d0   :  { %8483 = vmatprep.subr.bf16.mxu1 %v9076_v1  ;;  %v3962_v39 = vsub.f32 %v3960_v12, %v3961_v30  ;;  %v9715_v34 = vpack.c.bf16 %v3968_v37, %v3961_v30  ;;  %v4942_v12 = vld [vmem:[#allocation5 + $0x90] sm:$0xff]  ;;  %v4964_v30 = vand.u32 4294901760, %v4943_v19  ;;  %v4945_v37 = vld [vmem:[#allocation5 + $0xa8] sm:$0xff] }
 0x7d1   :  { %v3942_v61 = vand.u32 4294901760, %v3941_v27  ;;  %v4961_v10 = vand.u32 4294901760, %v4942_v12 }
 0x7d2   :  { %8551 = vmatpush3.bf16.msra.mxu0 %v9683_v35  ;;  %v3963_v44 = vand.u32 4294901760, %v3962_v39  ;;  %v4970_v39 = vand.u32 4294901760, %v4945_v37  ;;  %v9851_v46 = vsub.f32 %v4943_v19, %v4964_v30 }
 0x7d3   :  { %8552 = vmatprep.subr.bf16.mxu0 %v9076_v1  ;;  %8485 = vmatpush3.bf16.msra.mxu1 %v9695_v17  ;;  %v9729_v32 = vpack.c.bf16 %v3942_v61, %v3935_v25 }
 0x7d4   :  { %8486 = vmatprep.subr.bf16.mxu1 %v9076_v1  ;;  %v9703_v49 = vpack.c.bf16 %v3970_v45, %v3963_v44  ;;  %v9849_v45 = vsub.f32 %v4942_v12, %v4961_v10  ;;  %v5057_v54 = vand.u32 4294901760, %v9851_v46 }
 0x7d6   :  { %8554 = vmatpush3.bf16.msra.mxu0 %v9689_v59 }
 0x7d7   :  { %8555 = vmatprep.subr.bf16.mxu0 %v9076_v1 }
 0x7da   :  { %8557 = vmatpush3.bf16.msra.mxu0 %v9695_v17 }
 0x7db   :  { %8558 = vmatprep.subr.bf16.mxu0 %v9076_v1 }
 0x8a0   :  { %v3840_v16 = vpop.f32.mrb[6].mxu0 }
 0x8a1   :  { %v9725_v23 = vadd.f32 %v6172_v53, %v3840_v16  ;;  %v7489_v4 = vpop.f32.mrb[7].mxu0 }
 0x8a3   :  { %v3845_v8 = vsel %vm543_vm2, %v9725_v23, 0 }
 0x8a4   :  { %v3920_v55 = vand.u32 4294901760, %v3845_v8 }
 0x8a6   :  { %v3921_v33 = vsub.f32 %v3845_v8, %v3920_v55 }
 0x8a8   :  { %v3922_v24 = vand.u32 4294901760, %v3921_v33 }
 0x8aa   :  { %v3923_v36 = vsub.f32 %v3921_v33, %v3922_v24 }
 0x8ac   :  { %v3924_v62 = vand.u32 4294901760, %v3923_v36 }
 0x8ae   :  { %7507 = vmatmul.mubr.f32.vlgmr.msra.gmra.mrb[6].mxu1 %v3924_v62 }
 0x8af   :  { %8488 = vmatpush3.bf16.msra.mxu1 %v9729_v32  ;;  %7525 = vmatprep.mubr.msk.f32.mxu1 %vm9075_vm0, %v9074_v0 }
 0x8b0   :  { %8489 = vmatprep.subr.bf16.mxu1 %v9076_v1 }
 0x8b3   :  { %8491 = vmatpush3.bf16.msra.mxu1 %v9701_v38 }
 0x8b4   :  { %8492 = vmatprep.subr.bf16.mxu1 %v9076_v1 }
 0x8b7   :  { %8494 = vmatpush3.bf16.msra.mxu1 %v9703_v49 }
 0x8b8   :  { %8495 = vmatprep.subr.bf16.mxu1 %v9076_v1 }
 0x8bb   :  { %8497 = vmatpush3.bf16.msra.mxu1 %v9705_v3 }
 0x8bc   :  { %8498 = vmatprep.subr.bf16.mxu1 %v9076_v1 }
 0x8be   :  { %7526 = vmatmul.mubr.f32.vlgmr.msra.gmra.mrb[6].mxu1 %v3920_v55 }
 0x8bf   :  { %8500 = vmatpush3.bf16.msra.mxu1 %v9740_v63  ;;  %7544 = vmatprep.mubr.msk.f32.mxu1 %vm9075_vm0, %v9074_v0 }
 0x8c0   :  { %8501 = vmatprep.subr.bf16.mxu1 %v9076_v1 }
 0x8c3   :  { %8503 = vmatpush3.bf16.msra.mxu1 %v9707_v29 }
 0x8c4   :  { %8504 = vmatprep.subr.bf16.mxu1 %v9076_v1 }
 0x8c7   :  { %8506 = vmatpush3.bf16.msra.mxu1 %v9709_v5 }
 0x8c8   :  { %8507 = vmatprep.subr.bf16.mxu1 %v9076_v1 }
 0x8cb   :  { %8509 = vmatpush3.bf16.msra.mxu1 %v9711_v6 }
 0x8cc   :  { %8510 = vmatprep.subr.bf16.mxu1 %v9076_v1 }
 0x8ce   :  { %7545 = vmatmul.mubr.f32.vlgmr.msra.gmra.mrb[6].mxu1 %v3921_v33 }
 0x8cf   :  { %8512 = vmatpush3.bf16.msra.mxu1 %v9634_v2  ;;  %7563 = vmatprep.mubr.msk.f32.mxu1 %vm9075_vm0, %v9074_v0 }
 0x8d0   :  { %8513 = vmatprep.subr.bf16.mxu1 %v9076_v1 }
 0x8d3   :  { %8515 = vmatpush3.bf16.msra.mxu1 %v9683_v35 }
 0x8d4   :  { %8516 = vmatprep.subr.bf16.mxu1 %v9076_v1 }
 0x8d7   :  { %8518 = vmatpush3.bf16.msra.mxu1 %v9689_v59 }
 0x8d8   :  { %8519 = vmatprep.subr.bf16.mxu1 %v9076_v1 }
 0x8db   :  { %8521 = vmatpush3.bf16.msra.mxu1 %v9695_v17 }
 0x8dc   :  { %8522 = vmatprep.subr.bf16.mxu1 %v9076_v1 }
 0x8de   :  { %7564 = vmatmul.mubr.f32.vlgmr.msra.gmra.mrb[6].mxu1 %v3922_v24 }
 0x8df   :  { %8524 = vmatpush3.bf16.msra.mxu1 %v9762_v58  ;;  %7582 = vmatprep.mubr.msk.f32.mxu1 %vm9075_vm0, %v9074_v0 }
 0x8e0   :  { %8525 = vmatprep.subr.bf16.mxu1 %v9076_v1 }
 0x8e3   :  { %8527 = vmatpush3.bf16.msra.mxu1 %v9713_v7 }
 0x8e4   :  { %8528 = vmatprep.subr.bf16.mxu1 %v9076_v1 }
 0x8e7   :  { %8530 = vmatpush3.bf16.msra.mxu1 %v9715_v34 }
 0x8e8   :  { %8531 = vmatprep.subr.bf16.mxu1 %v9076_v1 }
 0x8eb   :  { %8533 = vmatpush3.bf16.msra.mxu1 %v9717_v28 }
 0x8ec   :  { %8534 = vmatprep.subr.bf16.mxu1 %v9076_v1 }
 0x8ee   :  { %7583 = vmatmul.mubr.f32.vlgmr.msra.gmra.mrb[6].mxu1 %v3920_v55 }
 0x8ef   :  { %8536 = vmatpush3.bf16.msra.mxu1 %v9634_v2  ;;  %7601 = vmatprep.mubr.msk.f32.mxu1 %vm9075_vm0, %v9074_v0 }
 0x8f0   :  { %8537 = vmatprep.subr.bf16.mxu1 %v9076_v1 }
 0x8f3   :  { %8539 = vmatpush3.bf16.msra.mxu1 %v9683_v35 }
 0x8f4   :  { %8540 = vmatprep.subr.bf16.mxu1 %v9076_v1 }
 0x8f7   :  { %8542 = vmatpush3.bf16.msra.mxu1 %v9689_v59 }
 0x8f8   :  { %8543 = vmatprep.subr.bf16.mxu1 %v9076_v1 }
 0x8fb   :  { %8545 = vmatpush3.bf16.msra.mxu1 %v9695_v17 }
 0x8fc   :  { %8618 = vmatprep.subr.bf16.mxu1 %v9076_v1 }
 0x8fe   :  { %7602 = vmatmul.mubr.f32.vlgmr.msra.gmra.mrb[6].mxu1 %v3920_v55 }
 0x8ff   :  { %7734 = vmatprep.mubr.msk.f32.mxu1 %vm9075_vm0, %v9074_v0 }
 0x9d1   :  { %v4380_v60 = vpop.f32.mrb[6].mxu1 }
 0x9d2   :  { %v9788_v9 = vsub.f32 %v9725_v23, %v4380_v60  ;;  %v7603_v11 = vpop.f32.mrb[7].mxu1  ;;  %v5058_v23 = vsub.f32 %v9851_v46, %v5057_v54 }
 0x9d4   :  { %v4385_v14 = vmul.f32 %v9788_v9, %v9788_v9  ;;  %v5059_v8 = vand.u32 4294901760, %v5058_v23 }
 0x9d6   :  { %v4387_v18 = vsel %vm543_vm2, %v4385_v14, 0 }
 0x9d7   :  { %v4462_v21 = vand.u32 4294901760, %v4387_v18 }
 0x9d9   :  { %v4463_v22 = vsub.f32 %v4387_v18, %v4462_v21 }
 0x9db   :  { %v4464_v26 = vand.u32 4294901760, %v4463_v22 }
 0x9dd   :  { %v4465_v31 = vsub.f32 %v4463_v22, %v4464_v26 }
 0x9df   :  { %v4466_v57 = vand.u32 4294901760, %v4465_v31 }
 0x9e1   :  { %7621 = vmatmul.mubr.f32.vlgmr.msra.gmra.mrb[8].mxu0 %v4466_v57 }
 0x9e2   :  { %8560 = vmatpush3.bf16.msra.mxu0 %v9729_v32  ;;  %7639 = vmatprep.mubr.msk.f32.mxu0 %vm9075_vm0, %v9074_v0 }
 0x9e3   :  { %8561 = vmatprep.subr.bf16.mxu0 %v9076_v1 }
 0x9e6   :  { %8563 = vmatpush3.bf16.msra.mxu0 %v9701_v38  ;;  %v4946_v38 = vld [vmem:[#allocation5 + $0xb0] sm:$0xff] }
 0x9e7   :  { %8564 = vmatprep.subr.bf16.mxu0 %v9076_v1  ;;  %v4973_v40 = vand.u32 4294901760, %v4946_v38 }
 0x9e9   :  { %v9860_v13 = vsub.f32 %v4946_v38, %v4973_v40 }
 0x9ea   :  { %8566 = vmatpush3.bf16.msra.mxu0 %v9703_v49  ;;  %v9855_v49 = vsub.f32 %v4945_v37, %v4970_v39  ;;  %v6173_v37 = vld [vmem:[#allocation7 + $0x107] ss:$0 sm:$0xff] }
 0x9eb   :  { %8567 = vmatprep.subr.bf16.mxu0 %v9076_v1  ;;  %v5078_v55 = vand.u32 4294901760, %v9860_v13 }
 0x9ec   :  { %v5071_v27 = vand.u32 4294901760, %v9855_v49 }
 0x9ed   :  { %v5079_v61 = vsub.f32 %v9860_v13, %v5078_v55 }
 0x9ee   :  { %8569 = vmatpush3.bf16.msra.mxu0 %v9705_v3  ;;  %v9863_v3 = vsub.f32 %v4947_v42, %v4976_v47  ;;  %v5072_v25 = vsub.f32 %v9855_v49, %v5071_v27  ;;  %v8673_v12 = vpack.c.bf16 %v5078_v55, %v5071_v27  ;;  %v5494_v27 = vlaneseq }
 0x9ef   :  { %8570 = vmatprep.subr.bf16.mxu0 %v9076_v1  ;;  %v5080_v36 = vand.u32 4294901760, %v5079_v61 }
 0x9f0   :  { %v5073_v24 = vand.u32 4294901760, %v5072_v25  ;;  %v5085_v32 = vand.u32 4294901760, %v9863_v3  ;;  %v9972_v55 = vand.u32 127, %v5494_v27 }
 0x9f1   :  { %7640 = vmatmul.mubr.f32.vlgmr.msra.gmra.mrb[8].mxu0 %v4462_v21 }
 0x9f2   :  { %8572 = vmatpush3.bf16.msra.mxu0 %v9740_v63  ;;  %7658 = vmatprep.mubr.msk.f32.mxu0 %vm9075_vm0, %v9074_v0  ;;  %v8637_v63 = vpack.c.bf16 %v5080_v36, %v5073_v24  ;;  %vm5496_vm3 = vcmp.lt.s32.totalorder %v9972_v55, 4 }
 0x9f3   :  { %8573 = vmatprep.subr.bf16.mxu0 %v9076_v1 }
 0x9f6   :  { %8575 = vmatpush3.bf16.msra.mxu0 %v9707_v29 }
 0x9f7   :  { %8576 = vmatprep.subr.bf16.mxu0 %v9076_v1 }
 0x9fa   :  { %8578 = vmatpush3.bf16.msra.mxu0 %v9709_v5  ;;  %v9868_v5 = vpack.c.bf16 %v4973_v40, %v4970_v39 }
 0x9fb   :  { %8579 = vmatprep.subr.bf16.mxu0 %v9076_v1 }
 0x9fe   :  { %8581 = vmatpush3.bf16.msra.mxu0 %v9711_v6 }
 0x9ff   :  { %8582 = vmatprep.subr.bf16.mxu0 %v9076_v1 }
 0xa01   :  { %7659 = vmatmul.mubr.f32.vlgmr.msra.gmra.mrb[8].mxu0 %v4463_v22 }
 0xa02   :  { %8584 = vmatpush3.bf16.msra.mxu0 %v9634_v2  ;;  %7677 = vmatprep.mubr.msk.f32.mxu0 %vm9075_vm0, %v9074_v0 }
 0xa03   :  { %8585 = vmatprep.subr.bf16.mxu0 %v9076_v1 }
 0xa06   :  { %8587 = vmatpush3.bf16.msra.mxu0 %v9683_v35 }
 0xa07   :  { %8588 = vmatprep.subr.bf16.mxu0 %v9076_v1 }
 0xa0a   :  { %8590 = vmatpush3.bf16.msra.mxu0 %v9689_v59 }
 0xa0b   :  { %8591 = vmatprep.subr.bf16.mxu0 %v9076_v1 }
 0xa0e   :  { %8593 = vmatpush3.bf16.msra.mxu0 %v9695_v17 }
 0xa0f   :  { %8594 = vmatprep.subr.bf16.mxu0 %v9076_v1 }
 0xa11   :  { %7678 = vmatmul.mubr.f32.vlgmr.msra.gmra.mrb[8].mxu0 %v4464_v26  ;;  %v8649_v26 = vpack.c.bf16 %v9860_v13, %v9855_v49  ;;  %v73_v13 = vld [vmem:[#allocation7 + $0x90] sm:$0xff] }
 0xa12   :  { %8596 = vmatpush3.bf16.msra.mxu0 %v9762_v58  ;;  %7696 = vmatprep.mubr.msk.f32.mxu0 %vm9075_vm0, %v9074_v0  ;;  %v5086_v58 = vsub.f32 %v9863_v3, %v5085_v32 }
 0xa13   :  { %8597 = vmatprep.subr.bf16.mxu0 %v9076_v1 }
 0xa14   :  { %v5087_v11 = vand.u32 4294901760, %v5086_v58 }
 0xa16   :  { %8599 = vmatpush3.bf16.msra.mxu0 %v9713_v7 }
 0xa17   :  { %8600 = vmatprep.subr.bf16.mxu0 %v9076_v1 }
 0xa1a   :  { %8602 = vmatpush3.bf16.msra.mxu0 %v9715_v34  ;;  %v5050_v34 = vand.u32 4294901760, %v9849_v45 }
 0xa1b   :  { %8603 = vmatprep.subr.bf16.mxu0 %v9076_v1 }
 0xa1c   :  { %v5051_v51 = vsub.f32 %v9849_v45, %v5050_v34 }
 0xa1e   :  { %8605 = vmatpush3.bf16.msra.mxu0 %v9717_v28  ;;  %v5052_v53 = vand.u32 4294901760, %v5051_v51 }
 0xa1f   :  { %8606 = vmatprep.subr.bf16.mxu0 %v9076_v1 }
 0xa21   :  { %7697 = vmatmul.mubr.f32.vlgmr.msra.gmra.mrb[8].mxu0 %v4462_v21 }
 0xa22   :  { %8608 = vmatpush3.bf16.msra.mxu0 %v9634_v2  ;;  %7715 = vmatprep.mubr.msk.f32.mxu0 %vm9075_vm0, %v9074_v0  ;;  %v4941_v2 = vld [vmem:[#allocation5 + $0x88] sm:$0xff] }
 0xa23   :  { %8609 = vmatprep.subr.bf16.mxu0 %v9076_v1  ;;  %v4958_v20 = vand.u32 4294901760, %v4941_v2 }
 0xa25   :  { %v9845_v43 = vpack.c.bf16 %v4961_v10, %v4958_v20  ;;  %v9847_v44 = vsub.f32 %v4941_v2, %v4958_v20 }
 0xa26   :  { %8611 = vmatpush3.bf16.msra.mxu0 %v9683_v35  ;;  %v4944_v35 = vld [vmem:[#allocation5 + $0xa0] sm:$0xff] }
 0xa27   :  { %8612 = vmatprep.subr.bf16.mxu0 %v9076_v1  ;;  %8620 = vmatpush3.bf16.msra.mxu1 %v9845_v43  ;;  %v5043_v7 = vand.u32 4294901760, %v9847_v44 }
 0xa28   :  { %8621 = vmatprep.subr.bf16.mxu1 %v9076_v1 }
 0xa29   :  { %v5044_v28 = vsub.f32 %v9847_v44, %v5043_v7  ;;  %v8667_v57 = vpack.c.bf16 %v5050_v34, %v5043_v7  ;;  %v76_v7 = vld [vmem:[#allocation7 + $0xa8] sm:$0xff] }
 0xa2a   :  { %8614 = vmatpush3.bf16.msra.mxu0 %v9689_v59  ;;  %v4967_v59 = vand.u32 4294901760, %v4944_v35 }
 0xa2b   :  { %8615 = vmatprep.subr.bf16.mxu0 %v9076_v1  ;;  %v5045_v52 = vand.u32 4294901760, %v5044_v28  ;;  %v5519_v28 = vand.u32 4294901760, %v76_v7 }
 0xa2c   :  { %v9853_v48 = vsub.f32 %v4944_v35, %v4967_v59  ;;  %v9858_v50 = vpack.c.bf16 %v4967_v59, %v4964_v30  ;;  %v6174_v59 = vld [vmem:[#allocation7 + $0x108] ss:$0 sm:$0xff] }
 0xa2d   :  { %v8631_v16 = vpack.c.bf16 %v5052_v53, %v5045_v52 }
 0xa2e   :  { %8617 = vmatpush3.bf16.msra.mxu0 %v9695_v17  ;;  %v4948_v17 = vld [vmem:[#allocation5 + $0xc0] sm:$0xff]  ;;  %8623 = vmatpush3.bf16.msra.mxu1 %v9858_v50  ;;  %v5064_v15 = vand.u32 4294901760, %v9853_v48  ;;  %v8646_v22 = vpack.c.bf16 %v9853_v48, %v9851_v46 }
 0xa2f   :  { %8738 = vmatprep.subr.bf16.mxu0 %v9076_v1  ;;  %v4979_v56 = vand.u32 4294901760, %v4948_v17  ;;  %8624 = vmatprep.subr.bf16.mxu1 %v9076_v1 }
 0xa30   :  { %v5065_v4 = vsub.f32 %v9853_v48, %v5064_v15  ;;  %v8670_v2 = vpack.c.bf16 %v5064_v15, %v5057_v54 }
 0xa31   :  { %7716 = vmatmul.mubr.f32.vlgmr.msra.gmra.mrb[8].mxu0 %v4462_v21  ;;  %v9865_v29 = vsub.f32 %v4948_v17, %v4979_v56  ;;  %v9872_v6 = vpack.c.bf16 %v4979_v56, %v4976_v47  ;;  %v8643_v21 = vpack.c.bf16 %v9849_v45, %v9847_v44 }
 0xa32   :  { %7934 = vmatprep.mubr.msk.f32.mxu0 %vm9075_vm0, %v9074_v0  ;;  %8626 = vmatpush3.bf16.msra.mxu1 %v9868_v5  ;;  %v5066_v41 = vand.u32 4294901760, %v5065_v4 }
 0xa33   :  { %8627 = vmatprep.subr.bf16.mxu1 %v9076_v1  ;;  %v5092_v62 = vand.u32 4294901760, %v9865_v29  ;;  %v8652_v31 = vpack.c.bf16 %v9865_v29, %v9863_v3  ;;  %v5510_v3 = vand.u32 4294901760, %v73_v13 }
 0xa34   :  { %v8634_v33 = vpack.c.bf16 %v5066_v41, %v5059_v8  ;;  %v9963_v8 = vsub.f32 %v76_v7, %v5519_v28 }
 0xa35   :  { %v5093_v60 = vsub.f32 %v9865_v29, %v5092_v62  ;;  %v8676_v19 = vpack.c.bf16 %v5092_v62, %v5085_v32  ;;  %v75_v29 = vld [vmem:[#allocation7 + $0xa0] sm:$0xff]  ;;  %v9947_v52 = vsub.f32 %v73_v13, %v5510_v3  ;;  %v77_v32 = vld [vmem:[#allocation7 + $0xb0] sm:$0xff]  ;;  %v78_v62 = vld [vmem:[#allocation7 + $0xb8] sm:$0xff] }
 0xa36   :  { %8629 = vmatpush3.bf16.msra.mxu1 %v9872_v6  ;;  %v5516_v34 = vand.u32 4294901760, %v75_v29  ;;  %v5525_v58 = vand.u32 4294901760, %v78_v62 }
 0xa37   :  { %8630 = vmatprep.subr.bf16.mxu1 %v9076_v1  ;;  %v5094_v14 = vand.u32 4294901760, %v5093_v60 }
 0xa38   :  { %v9961_v4 = vsub.f32 %v75_v29, %v5516_v34 }
 0xa39   :  { %v8640_v18 = vpack.c.bf16 %v5094_v14, %v5087_v11  ;;  %v9985_v11 = vsub.f32 %v78_v62, %v5525_v58  ;;  %v79_v14 = vld [vmem:[#allocation7 + $0xc0] sm:$0xff] }
 0xa3a   :  { %v8745_v41 = vpack.c.bf16 %v9963_v8, %v9961_v4 }
 0xb04   :  { %v4922_v20 = vpop.f32.mrb[8].mxu0 }
 0xb05   :  { %v8839_v10 = vadd.f32 1e-05, %v4922_v20  ;;  %v7717_v35 = vpop.f32.mrb[9].mxu0 }
 0xb07   :  { %8967 = vrsqrt.f32 %v8839_v10 }
 0xb11   :  { %v8968_v30 = vpop.eup %8967 }
 0xb12   :  { %v4927_v38 = vmul.f32 %v8968_v30, %v9788_v9  ;;  %v71_v9 = vld [vmem:[#allocation7 + $0x80] sm:$0xff] }
 0xb13   :  { %v5504_v47 = vand.u32 4294901760, %v71_v9 }
 0xb14   :  { %v4933_v39 = vmul.f32 %v6173_v37, %v4927_v38 }
 0xb15   :  { %v9943_v51 = vsub.f32 %v71_v9, %v5504_v47 }
 0xb16   :  { %v4939_v40 = vadd.f32 %v6174_v59, %v4933_v39  ;;  %v83_v59 = vld [vmem:[#allocation7 + $0xe0] sm:$0xff]  ;;  %v84_v39 = vld [vmem:[#allocation7 + $0xe8] sm:$0xff] }
 0xb18   :  { %8969 = vtanh.f32 %v4939_v40 }
 0xb22   :  { %v8970_v42 = vpop.eup %8969 }
 0xb23   :  { %v4955_v17 = vsel %vm543_vm2, %v8970_v42, 0  ;;  %v5540_v42 = vand.u32 4294901760, %v83_v59 }
 0xb24   :  { %v5030_v44 = vand.u32 4294901760, %v4955_v17 }
 0xb26   :  { %v5031_v45 = vsub.f32 %v4955_v17, %v5030_v44  ;;  %v5543_v17 = vand.u32 4294901760, %v84_v39 }
 0xb28   :  { %v5032_v46 = vand.u32 4294901760, %v5031_v45  ;;  %v10027_v29 = vpack.c.bf16 %v5543_v17, %v5540_v42 }
 0xb2a   :  { %v5033_v48 = vsub.f32 %v5031_v45, %v5032_v46 }
 0xb2c   :  { %v5034_v49 = vand.u32 4294901760, %v5033_v48  ;;  %v85_v48 = vld [vmem:[#allocation7 + $0xf0] sm:$0xff] }
 0xb2e   :  { %7735 = vmatmul.mubr.f32.vlgmr.msra.gmra.mrb[8].mxu1 %v5034_v49  ;;  %v86_v49 = vld [vmem:[#allocation7 + $0xf8] sm:$0xff] }
 0xb2f   :  { %8632 = vmatpush3.bf16.msra.mxu1 %v8631_v16  ;;  %7753 = vmatprep.mubr.msk.f32.mxu1 %vm9075_vm0, %v9074_v0  ;;  %v5549_v13 = vand.u32 4294901760, %v86_v49 }
 0xb30   :  { %8633 = vmatprep.subr.bf16.mxu1 %v9076_v1 }
 0xb33   :  { %8635 = vmatpush3.bf16.msra.mxu1 %v8634_v33  ;;  %v6175_v33 = vld [vmem:[#allocation7 + $0x109] ss:$0 sm:$0xff] }
 0xb34   :  { %8636 = vmatprep.subr.bf16.mxu1 %v9076_v1 }
 0xb37   :  { %8638 = vmatpush3.bf16.msra.mxu1 %v8637_v63  ;;  %v5522_v63 = vand.u32 4294901760, %v77_v32 }
 0xb38   :  { %8639 = vmatprep.subr.bf16.mxu1 %v9076_v1 }
 0xb39   :  { %v9983_v60 = vsub.f32 %v77_v32, %v5522_v63  ;;  %v10000_v30 = vpack.c.bf16 %v5525_v58, %v5522_v63 }
 0xb3b   :  { %8641 = vmatpush3.bf16.msra.mxu1 %v8640_v18  ;;  %v80_v18 = vld [vmem:[#allocation7 + $0xc8] sm:$0xff] }
 0xb3c   :  { %8642 = vmatprep.subr.bf16.mxu1 %v9076_v1 }
 0xb3e   :  { %7754 = vmatmul.mubr.f32.vlgmr.msra.gmra.mrb[8].mxu1 %v5030_v44 }
 0xb3f   :  { %8644 = vmatpush3.bf16.msra.mxu1 %v8643_v21  ;;  %7772 = vmatprep.mubr.msk.f32.mxu1 %vm9075_vm0, %v9074_v0  ;;  %v8748_v21 = vpack.c.bf16 %v9985_v11, %v9983_v60 }
 0xb40   :  { %8645 = vmatprep.subr.bf16.mxu1 %v9076_v1 }
 0xb43   :  { %8647 = vmatpush3.bf16.msra.mxu1 %v8646_v22  ;;  %v5528_v22 = vand.u32 4294901760, %v79_v14 }
 0xb44   :  { %8648 = vmatprep.subr.bf16.mxu1 %v9076_v1 }
 0xb47   :  { %8650 = vmatpush3.bf16.msra.mxu1 %v8649_v26  ;;  %v5531_v26 = vand.u32 4294901760, %v80_v18 }
 0xb48   :  { %8651 = vmatprep.subr.bf16.mxu1 %v9076_v1 }
 0xb4b   :  { %8653 = vmatpush3.bf16.msra.mxu1 %v8652_v31  ;;  %v9989_v31 = vpack.c.bf16 %v5519_v28, %v5516_v34  ;;  %v5646_v34 = vand.u32 4294901760, %v9985_v11 }
 0xb4c   :  { %8654 = vmatprep.subr.bf16.mxu1 %v9076_v1 }
 0xb4e   :  { %7773 = vmatmul.mubr.f32.vlgmr.msra.gmra.mrb[8].mxu1 %v5031_v45  ;;  %v10013_v45 = vsub.f32 %v83_v59, %v5540_v42 }
 0xb4f   :  { %8656 = vmatpush3.bf16.msra.mxu1 %v9845_v43  ;;  %7791 = vmatprep.mubr.msk.f32.mxu1 %vm9075_vm0, %v9074_v0 }
 0xb50   :  { %8657 = vmatprep.subr.bf16.mxu1 %v9076_v1 }
 0xb53   :  { %8659 = vmatpush3.bf16.msra.mxu1 %v9858_v50 }
 0xb54   :  { %8660 = vmatprep.subr.bf16.mxu1 %v9076_v1 }
 0xb57   :  { %8662 = vmatpush3.bf16.msra.mxu1 %v9868_v5 }
 0xb58   :  { %8663 = vmatprep.subr.bf16.mxu1 %v9076_v1 }
 0xb5b   :  { %8665 = vmatpush3.bf16.msra.mxu1 %v9872_v6 }
 0xb5c   :  { %8666 = vmatprep.subr.bf16.mxu1 %v9076_v1 }
 0xb5e   :  { %7792 = vmatmul.mubr.f32.vlgmr.msra.gmra.mrb[8].mxu1 %v5032_v46  ;;  %v10015_v46 = vsub.f32 %v84_v39, %v5543_v17 }
 0xb5f   :  { %8668 = vmatpush3.bf16.msra.mxu1 %v8667_v57  ;;  %7810 = vmatprep.mubr.msk.f32.mxu1 %vm9075_vm0, %v9074_v0  ;;  %v9991_v57 = vsub.f32 %v79_v14, %v5528_v22 }
 0xb60   :  { %8669 = vmatprep.subr.bf16.mxu1 %v9076_v1  ;;  %v8757_v9 = vpack.c.bf16 %v10015_v46, %v10013_v45 }
 0xb61   :  { %v5653_v27 = vand.u32 4294901760, %v9991_v57 }
 0xb63   :  { %8671 = vmatpush3.bf16.msra.mxu1 %v8670_v2  ;;  %v9993_v2 = vsub.f32 %v80_v18, %v5531_v26 }
 0xb64   :  { %8672 = vmatprep.subr.bf16.mxu1 %v9076_v1 }
 0xb65   :  { %v8751_v20 = vpack.c.bf16 %v9993_v2, %v9991_v57 }
 0xb67   :  { %8674 = vmatpush3.bf16.msra.mxu1 %v8673_v12  ;;  %v81_v12 = vld [vmem:[#allocation7 + $0xd0] sm:$0xff] }
 0xb68   :  { %8675 = vmatprep.subr.bf16.mxu1 %v9076_v1  ;;  %v5534_v10 = vand.u32 4294901760, %v81_v12 }
 0xb6a   :  { %v10002_v37 = vsub.f32 %v81_v12, %v5534_v10 }
 0xb6b   :  { %8677 = vmatpush3.bf16.msra.mxu1 %v8676_v19  ;;  %v82_v19 = vld [vmem:[#allocation7 + $0xd8] sm:$0xff] }
 0xb6c   :  { %8678 = vmatprep.subr.bf16.mxu1 %v9076_v1  ;;  %v5537_v35 = vand.u32 4294901760, %v82_v19  ;;  %v5667_v58 = vand.u32 4294901760, %v10002_v37 }
 0xb6e   :  { %7811 = vmatmul.mubr.f32.vlgmr.msra.gmra.mrb[8].mxu1 %v5030_v44  ;;  %v10004_v38 = vsub.f32 %v82_v19, %v5537_v35 }
 0xb6f   :  { %8680 = vmatpush3.bf16.msra.mxu1 %v9845_v43  ;;  %7829 = vmatprep.mubr.msk.f32.mxu1 %vm9075_vm0, %v9074_v0  ;;  %v72_v43 = vld [vmem:[#allocation7 + $0x88] sm:$0xff] }
 0xb70   :  { %8681 = vmatprep.subr.bf16.mxu1 %v9076_v1  ;;  %v5507_v56 = vand.u32 4294901760, %v72_v43  ;;  %v8754_v40 = vpack.c.bf16 %v10004_v38, %v10002_v37 }
 0xb72   :  { %v9949_v53 = vpack.c.bf16 %v5507_v56, %v5504_v47  ;;  %v10022_v47 = vpack.c.bf16 %v5537_v35, %v5534_v10 }
 0xb73   :  { %8683 = vmatpush3.bf16.msra.mxu1 %v9858_v50  ;;  %v74_v50 = vld [vmem:[#allocation7 + $0x98] sm:$0xff] }
 0xb74   :  { %8684 = vmatprep.subr.bf16.mxu1 %v9076_v1 }
 0xb77   :  { %8686 = vmatpush3.bf16.msra.mxu1 %v9868_v5  ;;  %v5513_v5 = vand.u32 4294901760, %v74_v50 }
 0xb78   :  { %8687 = vmatprep.subr.bf16.mxu1 %v9076_v1 }
 0xb79   :  { %v9951_v54 = vsub.f32 %v74_v50, %v5513_v5  ;;  %v9956_v16 = vpack.c.bf16 %v5513_v5, %v5510_v3  ;;  %v5701_v50 = vsub.f32 %v86_v49, %v5549_v13  ;;  %v5639_v5 = vand.u32 4294901760, %v9983_v60 }
 0xb7b   :  { %8689 = vmatpush3.bf16.msra.mxu1 %v9872_v6  ;;  %v9945_v6 = vsub.f32 %v72_v43, %v5507_v56  ;;  %v8742_v23 = vpack.c.bf16 %v9951_v54, %v9947_v52  ;;  %v5546_v43 = vand.u32 4294901760, %v85_v48  ;;  %v5640_v28 = vsub.f32 %v9983_v60, %v5639_v5 }
 0xb7c   :  { %8690 = vmatprep.subr.bf16.mxu1 %v9076_v1  ;;  %v5674_v60 = vand.u32 4294901760, %v10004_v38  ;;  %v5702_v59 = vand.u32 4294901760, %v5701_v50 }
 0xb7d   :  { %v8739_v15 = vpack.c.bf16 %v9945_v6, %v9943_v51  ;;  %v5694_v56 = vsub.f32 %v85_v48, %v5546_v43  ;;  %v10032_v7 = vpack.c.bf16 %v5549_v13, %v5546_v43  ;;  %v10062_v48 = vpack.c.bf16 %v5646_v34, %v5639_v5 }
 0xb7e   :  { %7830 = vmatmul.mubr.f32.vlgmr.msra.gmra.mrb[8].mxu1 %v5030_v44  ;;  %v10011_v44 = vpack.c.bf16 %v5531_v26, %v5528_v22  ;;  %v5675_v18 = vsub.f32 %v10004_v38, %v5674_v60  ;;  %v5681_v26 = vand.u32 4294901760, %v10013_v45  ;;  %v5703_v38 = vsub.f32 %v5701_v50, %v5702_v59 }
 0xb7f   :  { %7864 = vmatprep.mubr.msk.f32.mxu1 %vm9075_vm0, %v9074_v0  ;;  %8692 = vmatpush3.bf16.msra.mxu1 %v9949_v53  ;;  %v8760_v3 = vpack.c.bf16 %v5701_v50, %v5694_v56  ;;  %v5695_v35 = vand.u32 4294901760, %v5694_v56  ;;  %v5597_v50 = vand.u32 4294901760, %v9943_v51 }
 0xb80   :  { %8693 = vmatprep.subr.bf16.mxu1 %v9076_v1  ;;  %8740 = vmatpush3.bf16.msra.mxu0 %v8739_v15  ;;  %v5647_v15 = vsub.f32 %v9985_v11, %v5646_v34  ;;  %v5668_v11 = vsub.f32 %v10002_v37, %v5667_v58  ;;  %v5676_v22 = vand.u32 4294901760, %v5675_v18  ;;  %v5704_v42 = vand.u32 4294901760, %v5703_v38 }
 0xb81   :  { %8741 = vmatprep.subr.bf16.mxu0 %v9076_v1  ;;  %v5696_v37 = vsub.f32 %v5694_v56, %v5695_v35  ;;  %v5598_v5 = vsub.f32 %v9943_v51, %v5597_v50  ;;  %v5632_v51 = vand.u32 4294901760, %v9963_v8 }
 0xb83   :  { %8695 = vmatpush3.bf16.msra.mxu1 %v9956_v16 }
 0xb84   :  { %8696 = vmatprep.subr.bf16.mxu1 %v9076_v1  ;;  %8743 = vmatpush3.bf16.msra.mxu0 %v8742_v23  ;;  %v5641_v23 = vand.u32 4294901760, %v5640_v28 }
 0xb85   :  { %8744 = vmatprep.subr.bf16.mxu0 %v9076_v1 }
 0xb87   :  { %8698 = vmatpush3.bf16.msra.mxu1 %v9989_v31 }
 0xb88   :  { %8746 = vmatpush3.bf16.msra.mxu0 %v8745_v41  ;;  %8699 = vmatprep.subr.bf16.mxu1 %v9076_v1  ;;  %v5648_v41 = vand.u32 4294901760, %v5647_v15  ;;  %v5611_v15 = vand.u32 4294901760, %v9947_v52 }
 0xb89   :  { %8747 = vmatprep.subr.bf16.mxu0 %v9076_v1 }
 0xb8b   :  { %8701 = vmatpush3.bf16.msra.mxu1 %v10000_v30 }
 0xb8c   :  { %8749 = vmatpush3.bf16.msra.mxu0 %v8748_v21  ;;  %8702 = vmatprep.subr.bf16.mxu1 %v9076_v1  ;;  %v5669_v21 = vand.u32 4294901760, %v5668_v11 }
 0xb8d   :  { %8750 = vmatprep.subr.bf16.mxu0 %v9076_v1 }
 0xb8e   :  { %v10054_v12 = vpack.c.bf16 %v5676_v22, %v5669_v21 }
 0xb8f   :  { %8704 = vmatpush3.bf16.msra.mxu1 %v10011_v44 }
 0xb90   :  { %8752 = vmatpush3.bf16.msra.mxu0 %v8751_v20  ;;  %8705 = vmatprep.subr.bf16.mxu1 %v9076_v1 }
 0xb91   :  { %8753 = vmatprep.subr.bf16.mxu0 %v9076_v1 }
 0xb93   :  { %8707 = vmatpush3.bf16.msra.mxu1 %v10022_v47 }
 0xb94   :  { %8755 = vmatpush3.bf16.msra.mxu0 %v8754_v40  ;;  %8708 = vmatprep.subr.bf16.mxu1 %v9076_v1  ;;  %v5697_v40 = vand.u32 4294901760, %v5696_v37 }
 0xb95   :  { %8756 = vmatprep.subr.bf16.mxu0 %v9076_v1 }
 0xb96   :  { %v10060_v17 = vpack.c.bf16 %v5704_v42, %v5697_v40 }
 0xb97   :  { %8710 = vmatpush3.bf16.msra.mxu1 %v10027_v29 }
 0xb98   :  { %8758 = vmatpush3.bf16.msra.mxu0 %v8757_v9  ;;  %8711 = vmatprep.subr.bf16.mxu1 %v9076_v1  ;;  %v10066_v9 = vpack.c.bf16 %v5674_v60, %v5667_v58 }
 0xb99   :  { %8759 = vmatprep.subr.bf16.mxu0 %v9076_v1 }
 0xb9b   :  { %8713 = vmatpush3.bf16.msra.mxu1 %v10032_v7 }
 0xb9c   :  { %8761 = vmatpush3.bf16.msra.mxu0 %v8760_v3  ;;  %8714 = vmatprep.subr.bf16.mxu1 %v9076_v1  ;;  %v5604_v3 = vand.u32 4294901760, %v9945_v6 }
 0xb9d   :  { %8762 = vmatprep.subr.bf16.mxu0 %v9076_v1 }
 0xb9e   :  { %v5605_v34 = vsub.f32 %v9945_v6, %v5604_v3 }
 0xc51   :  { %v5490_v25 = vpop.f32.mrb[8].mxu1 }
 0xc52   :  { %v9975_v61 = vadd.f32 %v6175_v33, %v5490_v25  ;;  %v7831_v24 = vpop.f32.mrb[9].mxu1  ;;  %v5660_v33 = vand.u32 4294901760, %v9993_v2  ;;  %v10042_v25 = vpack.c.bf16 %v5648_v41, %v5641_v23  ;;  %v5618_v23 = vand.u32 4294901760, %v9951_v54 }
 0xc53   :  { %v5654_v24 = vsub.f32 %v9991_v57, %v5653_v27  ;;  %v5688_v57 = vand.u32 4294901760, %v10015_v46 }
 0xc54   :  { %v9980_v36 = vsel %vm5496_vm3, %v9975_v61, -inf  ;;  %v5661_v32 = vsub.f32 %v9993_v2, %v5660_v33  ;;  %v5682_v2 = vsub.f32 %v10013_v45, %v5681_v26  ;;  %v10064_v49 = vpack.c.bf16 %v5660_v33, %v5653_v27 }
 0xc55   :  { %5498 = vmax.xlane.f32.xlu0 %v9980_v36  ;;  %v5655_v62 = vand.u32 4294901760, %v5654_v24  ;;  %v5689_v19 = vsub.f32 %v10015_v46, %v5688_v57  ;;  %v10068_v45 = vpack.c.bf16 %v5688_v57, %v5681_v26  ;;  %v10070_v46 = vpack.c.bf16 %v5702_v59, %v5695_v35 }
 0xc56   :  { %v5662_v63 = vand.u32 4294901760, %v5661_v32  ;;  %v5683_v20 = vand.u32 4294901760, %v5682_v2  ;;  %v5606_v33 = vand.u32 4294901760, %v5605_v34  ;;  %v5612_v24 = vsub.f32 %v9947_v52, %v5611_v15 }
 0xc57   :  { %v5690_v10 = vand.u32 4294901760, %v5689_v19  ;;  %v5619_v32 = vsub.f32 %v9951_v54, %v5618_v23  ;;  %v5633_v54 = vsub.f32 %v9963_v8, %v5632_v51  ;;  %v8787_v8 = vpack.c.bf16 %v5604_v3, %v5597_v50 }
 0xc58   :  { %v10048_v14 = vpack.c.bf16 %v5662_v63, %v5655_v62  ;;  %v5625_v62 = vand.u32 4294901760, %v9961_v4  ;;  %v5613_v60 = vand.u32 4294901760, %v5612_v24 }
 0xc59   :  { %v10058_v39 = vpack.c.bf16 %v5690_v10, %v5683_v20  ;;  %v5620_v11 = vand.u32 4294901760, %v5619_v32  ;;  %v5634_v26 = vand.u32 4294901760, %v5633_v54 }
 0xc5a   :  { %v5626_v52 = vsub.f32 %v9961_v4, %v5625_v62 }
 0xc5b   :  { %v8718_v21 = vpack.c.bf16 %v5620_v11, %v5613_v60 }
 0xc5c   :  { %v5627_v22 = vand.u32 4294901760, %v5626_v52 }
 0xc5e   :  { %v8721_v4 = vpack.c.bf16 %v5634_v26, %v5627_v22 }
 0xce2   :  { %v10072_v43 = vpop.xlane.xlu0 %5498 }
 0xce3   :  { %v5500_v13 = vsub.f32 %v9980_v36, %v10072_v43  ;;  %v5599_v36 = vand.u32 4294901760, %v5598_v5 }
 0xce5   :  { %v5501_v56 = vmul.f32 1.442695, %v5500_v13  ;;  %v8715_v58 = vpack.c.bf16 %v5606_v33, %v5599_v36 }
 0xce7   :  { %8971 = vpow2.f32 %v5501_v56 }
 0xcf1   :  { %v8972_v28 = vpop.eup %8971 }
 0xcf2   :  { %v10082_v41 = vand.u32 4294901760, %v8972_v28 }
 0xcf4   :  { %v5585_v27 = vsub.f32 %v8972_v28, %v10082_v41 }
 0xcf6   :  { %7935 = vmatmul.mubr.f32.vlgmr.msra.gmra.mrb[10].mxu0 %v5585_v27  ;;  %v5586_v6 = vand.u32 4294901760, %v5585_v27 }
 0xcf7   :  { %8764 = vmatpush3.bf16.msra.mxu0 %v9949_v53  ;;  %7969 = vmatprep.mubr.msk.f32.mxu0 %vm9075_vm0, %v9074_v0 }
 0xcf8   :  { %8765 = vmatprep.subr.bf16.mxu0 %v9076_v1  ;;  %v5587_v63 = vsub.f32 %v5585_v27, %v5586_v6 }
 0xcfa   :  { %v5588_v18 = vand.u32 4294901760, %v5587_v63 }
 0xcfb   :  { %8767 = vmatpush3.bf16.msra.mxu0 %v9956_v16 }
 0xcfc   :  { %7865 = vmatmul.mubr.f32.vlgmr.msra.gmra.mrb[10].mxu1 %v5588_v18  ;;  %8768 = vmatprep.subr.bf16.mxu0 %v9076_v1 }
 0xcfd   :  { %8716 = vmatpush3.bf16.msra.mxu1 %v8715_v58  ;;  %7899 = vmatprep.mubr.msk.f32.mxu1 %vm9075_vm0, %v9074_v0 }
 0xcfe   :  { %8717 = vmatprep.subr.bf16.mxu1 %v9076_v1 }
 0xcff   :  { %8770 = vmatpush3.bf16.msra.mxu0 %v9989_v31 }
 0xd00   :  { %8771 = vmatprep.subr.bf16.mxu0 %v9076_v1 }
 0xd01   :  { %8719 = vmatpush3.bf16.msra.mxu1 %v8718_v21 }
 0xd02   :  { %8720 = vmatprep.subr.bf16.mxu1 %v9076_v1 }
 0xd03   :  { %8773 = vmatpush3.bf16.msra.mxu0 %v10000_v30 }
 0xd04   :  { %8774 = vmatprep.subr.bf16.mxu0 %v9076_v1 }
 0xd05   :  { %8722 = vmatpush3.bf16.msra.mxu1 %v8721_v4 }
 0xd06   :  { %8723 = vmatprep.subr.bf16.mxu1 %v9076_v1 }
 0xd07   :  { %8776 = vmatpush3.bf16.msra.mxu0 %v10011_v44 }
 0xd08   :  { %8777 = vmatprep.subr.bf16.mxu0 %v9076_v1 }
 0xd09   :  { %8725 = vmatpush3.bf16.msra.mxu1 %v10042_v25  ;;  %v8790_v25 = vpack.c.bf16 %v5618_v23, %v5611_v15 }
 0xd0a   :  { %8726 = vmatprep.subr.bf16.mxu1 %v9076_v1 }
 0xd0b   :  { %8779 = vmatpush3.bf16.msra.mxu0 %v10022_v47 }
 0xd0c   :  { %8780 = vmatprep.subr.bf16.mxu0 %v9076_v1 }
 0xd0d   :  { %8728 = vmatpush3.bf16.msra.mxu1 %v10048_v14  ;;  %v8793_v14 = vpack.c.bf16 %v5632_v51, %v5625_v62 }
 0xd0e   :  { %8729 = vmatprep.subr.bf16.mxu1 %v9076_v1 }
 0xd0f   :  { %8782 = vmatpush3.bf16.msra.mxu0 %v10027_v29 }
 0xd10   :  { %8783 = vmatprep.subr.bf16.mxu0 %v9076_v1 }
 0xd11   :  { %8731 = vmatpush3.bf16.msra.mxu1 %v10054_v12 }
 0xd12   :  { %8732 = vmatprep.subr.bf16.mxu1 %v9076_v1 }
 0xd13   :  { %8785 = vmatpush3.bf16.msra.mxu0 %v10032_v7 }
 0xd14   :  { %8786 = vmatprep.subr.bf16.mxu0 %v9076_v1 }
 0xd15   :  { %8734 = vmatpush3.bf16.msra.mxu1 %v10058_v39 }
 0xd16   :  { %7970 = vmatmul.mubr.f32.vlgmr.msra.gmra.mrb[10].mxu0 %v5586_v6  ;;  %8735 = vmatprep.subr.bf16.mxu1 %v9076_v1 }
 0xd17   :  { %8788 = vmatpush3.bf16.msra.mxu0 %v8787_v8  ;;  %8004 = vmatprep.mubr.msk.f32.mxu0 %vm9075_vm0, %v9074_v0 }
 0xd18   :  { %8789 = vmatprep.subr.bf16.mxu0 %v9076_v1 }
 0xd19   :  { %8737 = vmatpush3.bf16.msra.mxu1 %v10060_v17 }
 0xd1b   :  { %8791 = vmatpush3.bf16.msra.mxu0 %v8790_v25 }
 0xd1c   :  { %7900 = vmatmul.mubr.f32.vlgmr.msra.gmra.mrb[10].mxu1 %v10082_v41  ;;  %8792 = vmatprep.subr.bf16.mxu0 %v9076_v1 }
 0xd1f   :  { %8794 = vmatpush3.bf16.msra.mxu0 %v8793_v14 }
 0xd20   :  { %8795 = vmatprep.subr.bf16.mxu0 %v9076_v1 }
 0xd23   :  { %8797 = vmatpush3.bf16.msra.mxu0 %v10062_v48 }
 0xd24   :  { %8798 = vmatprep.subr.bf16.mxu0 %v9076_v1 }
 0xd27   :  { %8800 = vmatpush3.bf16.msra.mxu0 %v10064_v49 }
 0xd28   :  { %8801 = vmatprep.subr.bf16.mxu0 %v9076_v1 }
 0xd2b   :  { %8803 = vmatpush3.bf16.msra.mxu0 %v10066_v9 }
 0xd2c   :  { %8804 = vmatprep.subr.bf16.mxu0 %v9076_v1 }
 0xd2f   :  { %8806 = vmatpush3.bf16.msra.mxu0 %v10068_v45 }
 0xd30   :  { %8807 = vmatprep.subr.bf16.mxu0 %v9076_v1 }
 0xd33   :  { %8809 = vmatpush3.bf16.msra.mxu0 %v10070_v46 }
 0xd34   :  { %8810 = vmatprep.subr.bf16.mxu0 %v9076_v1 }
 0xd36   :  { %8005 = vmatmul.mubr.f32.vlgmr.msra.gmra.mrb[10].mxu0 %v10082_v41 }
 0xd37   :  { %8812 = vmatpush3.bf16.msra.mxu0 %v9949_v53  ;;  %8039 = vmatprep.mubr.msk.f32.mxu0 %vm9075_vm0, %v9074_v0 }
 0xd38   :  { %8813 = vmatprep.subr.bf16.mxu0 %v9076_v1 }
 0xd3b   :  { %8815 = vmatpush3.bf16.msra.mxu0 %v9956_v16 }
 0xd3c   :  { %8816 = vmatprep.subr.bf16.mxu0 %v9076_v1 }
 0xd3f   :  { %8818 = vmatpush3.bf16.msra.mxu0 %v9989_v31 }
 0xd40   :  { %8819 = vmatprep.subr.bf16.mxu0 %v9076_v1 }
 0xd43   :  { %8821 = vmatpush3.bf16.msra.mxu0 %v10000_v30 }
 0xd44   :  { %8822 = vmatprep.subr.bf16.mxu0 %v9076_v1 }
 0xd47   :  { %8824 = vmatpush3.bf16.msra.mxu0 %v10011_v44 }
 0xd48   :  { %8825 = vmatprep.subr.bf16.mxu0 %v9076_v1 }
 0xd4b   :  { %8827 = vmatpush3.bf16.msra.mxu0 %v10022_v47 }
 0xd4c   :  { %8828 = vmatprep.subr.bf16.mxu0 %v9076_v1 }
 0xd4f   :  { %8830 = vmatpush3.bf16.msra.mxu0 %v10027_v29 }
 0xd50   :  { %8831 = vmatprep.subr.bf16.mxu0 %v9076_v1 }
 0xd53   :  { %8833 = vmatpush3.bf16.msra.mxu0 %v10032_v7 }
 0xd56   :  { %8040 = vmatmul.mubr.f32.vlgmr.msra.gmra.mrb[10].mxu0 %v10082_v41 }
 0xdef   :  { %v5741_v0 = vpop.f32.mrb[10].mxu1 }
 0xdf0   :  { %v7901_v53 = vpop.f32.mrb[11].mxu1 }
 0xe29   :  { %v6140_v16 = vpop.f32.mrb[10].mxu0 }
 0xe2a   :  { %v8841_v31 = vadd.f32 %v6140_v16, %v5741_v0  ;;  %v8041_v30 = vpop.f32.mrb[11].mxu0 }
 0xe2c   :  { %8973 = vlog2.f32 %v8841_v31 }
 0xe36   :  { %v8974_v44 = vpop.eup %8973 }
 0xe37   :  { %v6145_v57 = vmul.f32 0.6931472, %v8974_v44 }
 0xe39   :  { %v6146_v47 = vadd.f32 %v6145_v57, %v10072_v43 }
 0xe3b   :  { %v6147_v29 = vsub.f32 %v9975_v61, %v6146_v47 }
 0xe3d   :  { %v6148_v1 = vsel %vm5496_vm3, %v6147_v29, %v9975_v61 }
 0xe3e   :  { %6149 = vst [vmem:[#allocation8] sm:$0xff] %v6148_v1 }
 0xe3f   :  { %9052 = shalt.err (!%p9049_p0)
}
 0xe40   :  { %s9053_s25 = scalar_lea.hbm %s10178_s3, 128 }
 0xe41   :  { %p9054_p1 = scmp.ne.s32.totalorder %s10178_s3, %s9053_s25  ;;  %p9057_p2 = scmp.lt.u32.totalorder %s9053_s25, %s10178_s3 }
 0xe43   :  { %p9059_p3 = pnand %p9057_p2, %p9054_p1 }
 0xe45   :  { %9062 = shalt.err (!%p9059_p3)
}
 0xe46   :  { %6159 = dma.vmem_to_hbm [thread:$0]  %s6157_s21, 128, %s10178_s3, [#allocation4]  }
 0xe47   :  { %9067 = dma.done.wait [#allocation4], 128  }
 0xe48   :  { %9068 = vsyncadd [#allocation4], 4294967168 }
 0xe49   :  { %6163 = vsyncpa [#allocation3], 1 }
 0xe4a   :  { %6164 = vsyncpa [#allocation6], 1 }
 0xe4b   :  { %6165 = vsyncpa [#allocation4], 1 }

</bundles_post_ra>
